<compile_context>
chip_gen: v5e
topology: v5e:2x2
jax: 0.10.0
libtpu: 0.0.40
codegen_flags: <defaults>
</compile_context>

<pallas_src>
import functools
import math

import jax
import jax.numpy as jnp
from jax.experimental import pallas as pl
from jax.experimental.pallas import tpu as pltpu


_RESIDENT_VMEM_BUDGET = 44 << 20   # conservative: stays under v7x's 64 MiB physical VMEM


def _batch_tiling(batch):
    """Pad batch to a multiple of 128 and pick a batch-tile size.

    Large tiles keep the MXU / weight-DMA roofline happy, but for batches >=256 we
    keep >=2 tiles so the 'parallel' batch axis can feed both v7x TensorCores."""
    b_pad = ((batch + 127) // 128) * 128
    if b_pad <= 128:
        return b_pad, b_pad
    for tm in (512, 256, 128):
        if b_pad % tm == 0 and b_pad // tm >= 2:
            return b_pad, tm
    return b_pad, 128


def _resident_kernel(x_ref, wh_ref, bh_ref, wo_ref, bo_ref, o_ref, *, n_hidden):
    """One grid step = one batch tile pushed through the whole (VMEM-resident) MLP."""
    h = x_ref[...].astype(jnp.bfloat16)                       # (tm, Z) bf16
    act = None
    for l in range(n_hidden):                                 # static unroll (7 layers)
        # gains are pre-folded into wh/bh; epilogue is just bias-add + lrelu select
        y = jnp.dot(h, wh_ref[l], preferred_element_type=jnp.float32) + bh_ref[l]
        act = jnp.where(y >= 0.0, y, 0.2 * y)                 # leaky_relu(0.2), f32
        h = act.astype(jnp.bfloat16)                          # carried bf16 activation
    # final z -> 1 projection: lane reduction against the lane-aligned (1, Z) row
    out = jnp.sum(act * wo_ref[...], axis=-1, keepdims=True) + bo_ref[...]
    o_ref[...] = out.astype(o_ref.dtype)


def _streaming_kernel(x_ref, wh_ref, bh_ref, wo_ref, bo_ref, o_ref, h_ref):
    """Fallback: one grid step = one hidden layer applied to one batch tile.

    Used only when the weight stack would not fit the VMEM residency budget
    (very large Z, mainly on v7x)."""
    l = pl.program_id(1)

    @pl.when(l == 0)
    def _():
        h_ref[...] = x_ref[...].astype(jnp.bfloat16)

    y = jnp.dot(h_ref[...], wh_ref[0], preferred_element_type=jnp.float32) + bh_ref[0]
    act = jnp.where(y >= 0.0, y, 0.2 * y)
    h_ref[...] = act.astype(jnp.bfloat16)

    @pl.when(l == pl.num_programs(1) - 1)
    def _():
        out = jnp.sum(act * wo_ref[...], axis=-1, keepdims=True) + bo_ref[...]
        o_ref[...] = out.astype(o_ref.dtype)


def latent_binary_classifier(latent, w_hidden, b_hidden, w_out, b_out,
                             *, force_streaming=False):
    """latent: (B, Z) f32.
    w_hidden: (n_hidden, Z, Z), torch (out, in) layout per layer.
    b_hidden: (n_hidden, Z).  w_out: (1, Z) torch (out, in).  b_out: (1,).
    Returns squeezed logits, matching torch's .squeeze()."""
    B, Z = latent.shape
    n_hidden = w_hidden.shape[0]
    assert n_hidden >= 1
    out_dtype = latent.dtype

    wg = 1.0 / math.sqrt(Z)      # FullyConnectedLayer weight_gain
    g = math.sqrt(2.0)           # bias_act default gain for 'lrelu'

    # --- one-time weight prep (in production, cache these across calls) ---
    # (in, out) layout so the kernel does h @ W; fold wg*g into the bf16 weights,
    # g into the hidden biases, wg into the output row.
    wh = (jnp.transpose(w_hidden, (0, 2, 1)).astype(jnp.float32)
          * (wg * g)).astype(jnp.bfloat16)                          # (n_hidden, Z, Z) bf16
    bh = (b_hidden.astype(jnp.float32) * g).reshape(n_hidden, 1, Z)  # (n_hidden, 1, Z) f32
    wo = (w_out.astype(jnp.float32) * wg).reshape(1, Z)              # (1, Z) f32
    bo = b_out.astype(jnp.float32).reshape(1, 1)                     # (1, 1) f32

    # --- batch padding / tiling ---
    B_pad, tm = _batch_tiling(B)
    if B_pad != B:
        latent_p = jnp.zeros((B_pad, Z), latent.dtype).at[:B, :].set(latent)
    else:
        latent_p = latent
    n_btiles = B_pad // tm

    # --- VMEM residency gate (budget assumes pipeline may double-buffer blocks) ---
    weight_vmem = 2 * (wh.size * 2) + 2 * (bh.size * 4) + 2 * (wo.size * 4 + bo.size * 4)
    act_vmem = 2 * (tm * Z * 4) + 2 * (tm * 4)
    resident = (not force_streaming) and (weight_vmem + act_vmem <= _RESIDENT_VMEM_BUDGET)

    flops = 2 * B_pad * Z * Z * n_hidden + 2 * B_pad * Z
    io_act_bytes = latent_p.size * 4 + B_pad * 4
    weight_bytes = wh.size * 2 + bh.size * 4 + wo.size * 4 + bo.size * 4

    if resident:
        needed = weight_vmem + act_vmem
        vmem_limit = int(min(max(needed + (8 << 20), 16 << 20), 60 << 20))
        cost = pl.CostEstimate(flops=flops, transcendentals=0,
                               bytes_accessed=int(weight_bytes + io_act_bytes))
        out = pl.pallas_call(
            functools.partial(_resident_kernel, n_hidden=n_hidden),
            out_shape=jax.ShapeDtypeStruct((B_pad, 1), out_dtype),
            grid_spec=pltpu.PrefetchScalarGridSpec(
                num_scalar_prefetch=0,
                grid=(n_btiles,),
                in_specs=[
                    pl.BlockSpec((tm, Z), lambda i: (i, 0)),              # latent tile
                    pl.BlockSpec((n_hidden, Z, Z), lambda i: (0, 0, 0)),  # resident weights
                    pl.BlockSpec((n_hidden, 1, Z), lambda i: (0, 0, 0)),  # resident biases
                    pl.BlockSpec((1, Z), lambda i: (0, 0)),               # w_out row
                    pl.BlockSpec((1, 1), lambda i: (0, 0)),               # b_out
                ],
                out_specs=pl.BlockSpec((tm, 1), lambda i: (i, 0)),
            ),
            compiler_params=pltpu.CompilerParams(
                dimension_semantics=("parallel",),
                vmem_limit_bytes=vmem_limit),
            cost_estimate=cost,
        )(latent_p, wh, bh, wo, bo)
    else:
        needed = 2 * (Z * Z * 2) + 2 * (Z * 4) + act_vmem + tm * Z * 2 + (wo.size * 4 + bo.size * 4)
        vmem_limit = int(min(max(needed + (8 << 20), 16 << 20), 60 << 20))
        cost = pl.CostEstimate(flops=flops, transcendentals=0,
                               bytes_accessed=int(n_btiles * weight_bytes + io_act_bytes))
        out = pl.pallas_call(
            _streaming_kernel,
            out_shape=jax.ShapeDtypeStruct((B_pad, 1), out_dtype),
            grid_spec=pltpu.PrefetchScalarGridSpec(
                num_scalar_prefetch=0,
                grid=(n_btiles, n_hidden),
                in_specs=[
                    pl.BlockSpec((tm, Z), lambda i, l: (i, 0)),        # latent tile
                    pl.BlockSpec((1, Z, Z), lambda i, l: (l, 0, 0)),   # per-layer weight
                    pl.BlockSpec((1, 1, Z), lambda i, l: (l, 0, 0)),   # per-layer bias
                    pl.BlockSpec((1, Z), lambda i, l: (0, 0)),         # w_out row
                    pl.BlockSpec((1, 1), lambda i, l: (0, 0)),         # b_out
                ],
                out_specs=pl.BlockSpec((tm, 1), lambda i, l: (i, 0)),
                scratch_shapes=[pltpu.VMEM((tm, Z), jnp.bfloat16)],    # carried h (bf16)
            ),
            compiler_params=pltpu.CompilerParams(
                dimension_semantics=("parallel", "arbitrary"),
                vmem_limit_bytes=vmem_limit),
            cost_estimate=cost,
        )(latent_p, wh, bh, wo, bo)

    return jnp.squeeze(out[:B])   # matches torch's .squeeze() on (B, 1)


def _reference_f32(latent, w_hidden, b_hidden, w_out, b_out):
    """Pure-JAX f32 reference of the PyTorch forward pass (torch (out,in) weights)."""
    Z = latent.shape[-1]
    wg = 1.0 / math.sqrt(Z)
    g = math.sqrt(2.0)
    h = latent.astype(jnp.float32)
    for l in range(w_hidden.shape[0]):
        y = h @ (w_hidden[l].astype(jnp.float32).T * wg) + b_hidden[l][None, :]
        h = jnp.where(y >= 0.0, y, 0.2 * y) * g
    y = h @ (w_out.astype(jnp.float32).T * wg) + b_out[None, :]
    return jnp.squeeze(y)


def _reference_kernel_precision(latent, w_hidden, b_hidden, w_out, b_out):
    """Reference mirroring the kernel's numerics (folded bf16 weights, bf16 activations)."""
    n_hidden, Z = w_hidden.shape[0], latent.shape[-1]
    wg = 1.0 / math.sqrt(Z)
    g = math.sqrt(2.0)
    wh = (jnp.transpose(w_hidden, (0, 2, 1)).astype(jnp.float32)
          * (wg * g)).astype(jnp.bfloat16)
    bh = (b_hidden.astype(jnp.float32) * g)
    wo = (w_out.astype(jnp.float32) * wg).reshape(1, Z)
    h = latent.astype(jnp.bfloat16)
    act = None
    for l in range(n_hidden):
        y = jnp.dot(h, wh[l], preferred_element_type=jnp.float32) + bh[l][None, :]
        act = jnp.where(y >= 0.0, y, 0.2 * y)
        h = act.astype(jnp.bfloat16)
    out = jnp.sum(act * wo, axis=-1, keepdims=True) + b_out.reshape(1, 1)
    return jnp.squeeze(out)


if __name__ == "__main__":
    # Small shapes consistent with the module: z_dims=128, n_layers=8, batch=8.
    Z_DIMS = 128
    N_LAYERS = 8
    BATCH = 8
    N_HIDDEN = N_LAYERS - 1

    key = jax.random.PRNGKey(0)
    k_lat, k_wh, k_bh, k_wo, k_bo = jax.random.split(key, 5)

    latent = jax.random.normal(k_lat, (BATCH, Z_DIMS), dtype=jnp.float32)

    # PyTorch init: weight ~ randn(out_features, in_features), bias = 0.
    # Small random biases are used here (instead of zeros) to exercise the bias path.
    w_hidden = jax.random.normal(k_wh, (N_HIDDEN, Z_DIMS, Z_DIMS), dtype=jnp.float32)
    b_hidden = 0.1 * jax.random.normal(k_bh, (N_HIDDEN, Z_DIMS), dtype=jnp.float32)
    w_out = jax.random.normal(k_wo, (1, Z_DIMS), dtype=jnp.float32)
    b_out = 0.1 * jax.random.normal(k_bo, (1,), dtype=jnp.float32)

    ref_match = _reference_kernel_precision(latent, w_hidden, b_hidden, w_out, b_out)
    ref_f32 = _reference_f32(latent, w_hidden, b_hidden, w_out, b_out)

    # Primary (VMEM-resident weight) path.
    out = jax.block_until_ready(
        latent_binary_classifier(latent, w_hidden, b_hidden, w_out, b_out))
    assert out.shape == (BATCH,), out.shape
    # Tight check vs a reference evaluated at identical (bf16) precision.
    assert jnp.allclose(out, ref_match, atol=2e-2, rtol=2e-2), (out, ref_match)
    # Looser sanity check vs the exact f32 PyTorch-semantics reference
    # (bf16 weights + bf16 inter-layer activations drift a little over 7 layers).
    assert jnp.allclose(out, ref_f32, atol=1e-1, rtol=1e-1), (out, ref_f32)

    # Streaming fallback path (used for very large Z that would not fit VMEM).
    out_s = jax.block_until_ready(
        latent_binary_classifier(latent, w_hidden, b_hidden, w_out, b_out,
                                 force_streaming=True))
    assert out_s.shape == (BATCH,), out_s.shape
    assert jnp.allclose(out_s, ref_match, atol=2e-2, rtol=2e-2), (out_s, ref_match)

    print("KERNEL_OK")
</pallas_src>

<mosaic_0001>
module attributes {stable_mosaic.version = 11 : i64} {
  func.func @_resident_kernel(%arg0: i32, %arg1: memref<128x128xf32, #tpu.memory_space<vmem>>, %arg2: memref<7x128x128xbf16, #tpu.memory_space<vmem>>, %arg3: memref<7x1x128xf32, #tpu.memory_space<vmem>>, %arg4: memref<1x128xf32, #tpu.memory_space<vmem>>, %arg5: memref<1x1xf32, #tpu.memory_space<vmem>>, %arg6: memref<128x1xf32, #tpu.memory_space<vmem>>) attributes {dimension_semantics = [#tpu.dimension_semantics<parallel>], iteration_bounds = array<i64: 1>, scalar_prefetch = 0 : i64, scratch_operands = 0 : i64, tpu.core_type = #tpu.core_type<tc>, window_params = [{transform_indices = @transform_0, window_bounds = array<i64: 128, 128>}, {pipeline_mode = #tpu.pipeline_mode<synchronous>, transform_indices = @transform_1, window_bounds = array<i64: 7, 128, 128>}, {pipeline_mode = #tpu.pipeline_mode<synchronous>, transform_indices = @transform_2, window_bounds = array<i64: 7, 1, 128>}, {pipeline_mode = #tpu.pipeline_mode<synchronous>, transform_indices = @transform_3, window_bounds = array<i64: 1, 128>}, {pipeline_mode = #tpu.pipeline_mode<synchronous>, transform_indices = @transform_4, window_bounds = array<i64: 1, 1>}, {transform_indices = @transform_5, window_bounds = array<i64: 128, 1>}]} {
    %c0 = arith.constant 0 : index
    %c0_0 = arith.constant 0 : index
    %0 = vector.load %arg1[%c0, %c0_0] : memref<128x128xf32, #tpu.memory_space<vmem>>, vector<128x128xf32>
    %1 = arith.truncf %0 : vector<128x128xf32> to vector<128x128xbf16>
    %c0_1 = arith.constant 0 : index
    %c0_2 = arith.constant 0 : index
    %c0_3 = arith.constant 0 : index
    %2 = vector.load %arg2[%c0_1, %c0_2, %c0_3] : memref<7x128x128xbf16, #tpu.memory_space<vmem>>, vector<1x128x128xbf16>
    %3 = vector.shape_cast %2 : vector<1x128x128xbf16> to vector<128x128xbf16>
    %cst = arith.constant dense<0.000000e+00> : vector<128x128xf32>
    %4 = tpu.matmul %1, %3, %cst {dimension_numbers = #tpu.dot_dimension_numbers<[1], [0], [0], [1], [0, 0, 1, 1], [], []>} : vector<128x128xbf16>, vector<128x128xbf16>, vector<128x128xf32> -> vector<128x128xf32>
    %c0_4 = arith.constant 0 : index
    %c0_5 = arith.constant 0 : index
    %c0_6 = arith.constant 0 : index
    %5 = vector.load %arg3[%c0_4, %c0_5, %c0_6] : memref<7x1x128xf32, #tpu.memory_space<vmem>>, vector<1x1x128xf32>
    %6 = vector.shape_cast %5 : vector<1x1x128xf32> to vector<1x128xf32>
    %7 = vector.broadcast %6 : vector<1x128xf32> to vector<128x128xf32>
    %8 = arith.addf %4, %7 : vector<128x128xf32>
    %cst_7 = arith.constant 0.000000e+00 : f32
    %9 = vector.broadcast %cst_7 : f32 to vector<128x128xf32>
    %10 = arith.cmpf oge, %8, %9 : vector<128x128xf32>
    %cst_8 = arith.constant 2.000000e-01 : f32
    %11 = vector.broadcast %cst_8 : f32 to vector<128x128xf32>
    %12 = arith.mulf %11, %8 : vector<128x128xf32>
    %13 = arith.select %10, %8, %12 : vector<128x128xi1>, vector<128x128xf32>
    %14 = arith.truncf %13 : vector<128x128xf32> to vector<128x128xbf16>
    %c1 = arith.constant 1 : index
    %c0_9 = arith.constant 0 : index
    %c0_10 = arith.constant 0 : index
    %15 = vector.load %arg2[%c1, %c0_9, %c0_10] : memref<7x128x128xbf16, #tpu.memory_space<vmem>>, vector<1x128x128xbf16>
    %16 = vector.shape_cast %15 : vector<1x128x128xbf16> to vector<128x128xbf16>
    %cst_11 = arith.constant dense<0.000000e+00> : vector<128x128xf32>
    %17 = tpu.matmul %14, %16, %cst_11 {dimension_numbers = #tpu.dot_dimension_numbers<[1], [0], [0], [1], [0, 0, 1, 1], [], []>} : vector<128x128xbf16>, vector<128x128xbf16>, vector<128x128xf32> -> vector<128x128xf32>
    %c1_12 = arith.constant 1 : index
    %c0_13 = arith.constant 0 : index
    %c0_14 = arith.constant 0 : index
    %18 = vector.load %arg3[%c1_12, %c0_13, %c0_14] : memref<7x1x128xf32, #tpu.memory_space<vmem>>, vector<1x1x128xf32>
    %19 = vector.shape_cast %18 : vector<1x1x128xf32> to vector<1x128xf32>
    %20 = vector.broadcast %19 : vector<1x128xf32> to vector<128x128xf32>
    %21 = arith.addf %17, %20 : vector<128x128xf32>
    %cst_15 = arith.constant 0.000000e+00 : f32
    %22 = vector.broadcast %cst_15 : f32 to vector<128x128xf32>
    %23 = arith.cmpf oge, %21, %22 : vector<128x128xf32>
    %cst_16 = arith.constant 2.000000e-01 : f32
    %24 = vector.broadcast %cst_16 : f32 to vector<128x128xf32>
    %25 = arith.mulf %24, %21 : vector<128x128xf32>
    %26 = arith.select %23, %21, %25 : vector<128x128xi1>, vector<128x128xf32>
    %27 = arith.truncf %26 : vector<128x128xf32> to vector<128x128xbf16>
    %c2 = arith.constant 2 : index
    %c0_17 = arith.constant 0 : index
    %c0_18 = arith.constant 0 : index
    %28 = vector.load %arg2[%c2, %c0_17, %c0_18] : memref<7x128x128xbf16, #tpu.memory_space<vmem>>, vector<1x128x128xbf16>
    %29 = vector.shape_cast %28 : vector<1x128x128xbf16> to vector<128x128xbf16>
    %cst_19 = arith.constant dense<0.000000e+00> : vector<128x128xf32>
    %30 = tpu.matmul %27, %29, %cst_19 {dimension_numbers = #tpu.dot_dimension_numbers<[1], [0], [0], [1], [0, 0, 1, 1], [], []>} : vector<128x128xbf16>, vector<128x128xbf16>, vector<128x128xf32> -> vector<128x128xf32>
    %c2_20 = arith.constant 2 : index
    %c0_21 = arith.constant 0 : index
    %c0_22 = arith.constant 0 : index
    %31 = vector.load %arg3[%c2_20, %c0_21, %c0_22] : memref<7x1x128xf32, #tpu.memory_space<vmem>>, vector<1x1x128xf32>
    %32 = vector.shape_cast %31 : vector<1x1x128xf32> to vector<1x128xf32>
    %33 = vector.broadcast %32 : vector<1x128xf32> to vector<128x128xf32>
    %34 = arith.addf %30, %33 : vector<128x128xf32>
    %cst_23 = arith.constant 0.000000e+00 : f32
    %35 = vector.broadcast %cst_23 : f32 to vector<128x128xf32>
    %36 = arith.cmpf oge, %34, %35 : vector<128x128xf32>
    %cst_24 = arith.constant 2.000000e-01 : f32
    %37 = vector.broadcast %cst_24 : f32 to vector<128x128xf32>
    %38 = arith.mulf %37, %34 : vector<128x128xf32>
    %39 = arith.select %36, %34, %38 : vector<128x128xi1>, vector<128x128xf32>
    %40 = arith.truncf %39 : vector<128x128xf32> to vector<128x128xbf16>
    %c3 = arith.constant 3 : index
    %c0_25 = arith.constant 0 : index
    %c0_26 = arith.constant 0 : index
    %41 = vector.load %arg2[%c3, %c0_25, %c0_26] : memref<7x128x128xbf16, #tpu.memory_space<vmem>>, vector<1x128x128xbf16>
    %42 = vector.shape_cast %41 : vector<1x128x128xbf16> to vector<128x128xbf16>
    %cst_27 = arith.constant dense<0.000000e+00> : vector<128x128xf32>
    %43 = tpu.matmul %40, %42, %cst_27 {dimension_numbers = #tpu.dot_dimension_numbers<[1], [0], [0], [1], [0, 0, 1, 1], [], []>} : vector<128x128xbf16>, vector<128x128xbf16>, vector<128x128xf32> -> vector<128x128xf32>
    %c3_28 = arith.constant 3 : index
    %c0_29 = arith.constant 0 : index
    %c0_30 = arith.constant 0 : index
    %44 = vector.load %arg3[%c3_28, %c0_29, %c0_30] : memref<7x1x128xf32, #tpu.memory_space<vmem>>, vector<1x1x128xf32>
    %45 = vector.shape_cast %44 : vector<1x1x128xf32> to vector<1x128xf32>
    %46 = vector.broadcast %45 : vector<1x128xf32> to vector<128x128xf32>
    %47 = arith.addf %43, %46 : vector<128x128xf32>
    %cst_31 = arith.constant 0.000000e+00 : f32
    %48 = vector.broadcast %cst_31 : f32 to vector<128x128xf32>
    %49 = arith.cmpf oge, %47, %48 : vector<128x128xf32>
    %cst_32 = arith.constant 2.000000e-01 : f32
    %50 = vector.broadcast %cst_32 : f32 to vector<128x128xf32>
    %51 = arith.mulf %50, %47 : vector<128x128xf32>
    %52 = arith.select %49, %47, %51 : vector<128x128xi1>, vector<128x128xf32>
    %53 = arith.truncf %52 : vector<128x128xf32> to vector<128x128xbf16>
    %c4 = arith.constant 4 : index
    %c0_33 = arith.constant 0 : index
    %c0_34 = arith.constant 0 : index
    %54 = vector.load %arg2[%c4, %c0_33, %c0_34] : memref<7x128x128xbf16, #tpu.memory_space<vmem>>, vector<1x128x128xbf16>
    %55 = vector.shape_cast %54 : vector<1x128x128xbf16> to vector<128x128xbf16>
    %cst_35 = arith.constant dense<0.000000e+00> : vector<128x128xf32>
    %56 = tpu.matmul %53, %55, %cst_35 {dimension_numbers = #tpu.dot_dimension_numbers<[1], [0], [0], [1], [0, 0, 1, 1], [], []>} : vector<128x128xbf16>, vector<128x128xbf16>, vector<128x128xf32> -> vector<128x128xf32>
    %c4_36 = arith.constant 4 : index
    %c0_37 = arith.constant 0 : index
    %c0_38 = arith.constant 0 : index
    %57 = vector.load %arg3[%c4_36, %c0_37, %c0_38] : memref<7x1x128xf32, #tpu.memory_space<vmem>>, vector<1x1x128xf32>
    %58 = vector.shape_cast %57 : vector<1x1x128xf32> to vector<1x128xf32>
    %59 = vector.broadcast %58 : vector<1x128xf32> to vector<128x128xf32>
    %60 = arith.addf %56, %59 : vector<128x128xf32>
    %cst_39 = arith.constant 0.000000e+00 : f32
    %61 = vector.broadcast %cst_39 : f32 to vector<128x128xf32>
    %62 = arith.cmpf oge, %60, %61 : vector<128x128xf32>
    %cst_40 = arith.constant 2.000000e-01 : f32
    %63 = vector.broadcast %cst_40 : f32 to vector<128x128xf32>
    %64 = arith.mulf %63, %60 : vector<128x128xf32>
    %65 = arith.select %62, %60, %64 : vector<128x128xi1>, vector<128x128xf32>
    %66 = arith.truncf %65 : vector<128x128xf32> to vector<128x128xbf16>
    %c5 = arith.constant 5 : index
    %c0_41 = arith.constant 0 : index
    %c0_42 = arith.constant 0 : index
    %67 = vector.load %arg2[%c5, %c0_41, %c0_42] : memref<7x128x128xbf16, #tpu.memory_space<vmem>>, vector<1x128x128xbf16>
    %68 = vector.shape_cast %67 : vector<1x128x128xbf16> to vector<128x128xbf16>
    %cst_43 = arith.constant dense<0.000000e+00> : vector<128x128xf32>
    %69 = tpu.matmul %66, %68, %cst_43 {dimension_numbers = #tpu.dot_dimension_numbers<[1], [0], [0], [1], [0, 0, 1, 1], [], []>} : vector<128x128xbf16>, vector<128x128xbf16>, vector<128x128xf32> -> vector<128x128xf32>
    %c5_44 = arith.constant 5 : index
    %c0_45 = arith.constant 0 : index
    %c0_46 = arith.constant 0 : index
    %70 = vector.load %arg3[%c5_44, %c0_45, %c0_46] : memref<7x1x128xf32, #tpu.memory_space<vmem>>, vector<1x1x128xf32>
    %71 = vector.shape_cast %70 : vector<1x1x128xf32> to vector<1x128xf32>
    %72 = vector.broadcast %71 : vector<1x128xf32> to vector<128x128xf32>
    %73 = arith.addf %69, %72 : vector<128x128xf32>
    %cst_47 = arith.constant 0.000000e+00 : f32
    %74 = vector.broadcast %cst_47 : f32 to vector<128x128xf32>
    %75 = arith.cmpf oge, %73, %74 : vector<128x128xf32>
    %cst_48 = arith.constant 2.000000e-01 : f32
    %76 = vector.broadcast %cst_48 : f32 to vector<128x128xf32>
    %77 = arith.mulf %76, %73 : vector<128x128xf32>
    %78 = arith.select %75, %73, %77 : vector<128x128xi1>, vector<128x128xf32>
    %79 = arith.truncf %78 : vector<128x128xf32> to vector<128x128xbf16>
    %c6 = arith.constant 6 : index
    %c0_49 = arith.constant 0 : index
    %c0_50 = arith.constant 0 : index
    %80 = vector.load %arg2[%c6, %c0_49, %c0_50] : memref<7x128x128xbf16, #tpu.memory_space<vmem>>, vector<1x128x128xbf16>
    %81 = vector.shape_cast %80 : vector<1x128x128xbf16> to vector<128x128xbf16>
    %cst_51 = arith.constant dense<0.000000e+00> : vector<128x128xf32>
    %82 = tpu.matmul %79, %81, %cst_51 {dimension_numbers = #tpu.dot_dimension_numbers<[1], [0], [0], [1], [0, 0, 1, 1], [], []>} : vector<128x128xbf16>, vector<128x128xbf16>, vector<128x128xf32> -> vector<128x128xf32>
    %c6_52 = arith.constant 6 : index
    %c0_53 = arith.constant 0 : index
    %c0_54 = arith.constant 0 : index
    %83 = vector.load %arg3[%c6_52, %c0_53, %c0_54] : memref<7x1x128xf32, #tpu.memory_space<vmem>>, vector<1x1x128xf32>
    %84 = vector.shape_cast %83 : vector<1x1x128xf32> to vector<1x128xf32>
    %85 = vector.broadcast %84 : vector<1x128xf32> to vector<128x128xf32>
    %86 = arith.addf %82, %85 : vector<128x128xf32>
    %cst_55 = arith.constant 0.000000e+00 : f32
    %87 = vector.broadcast %cst_55 : f32 to vector<128x128xf32>
    %88 = arith.cmpf oge, %86, %87 : vector<128x128xf32>
    %cst_56 = arith.constant 2.000000e-01 : f32
    %89 = vector.broadcast %cst_56 : f32 to vector<128x128xf32>
    %90 = arith.mulf %89, %86 : vector<128x128xf32>
    %91 = arith.select %88, %86, %90 : vector<128x128xi1>, vector<128x128xf32>
    %c0_57 = arith.constant 0 : index
    %c0_58 = arith.constant 0 : index
    %92 = vector.load %arg4[%c0_57, %c0_58] : memref<1x128xf32, #tpu.memory_space<vmem>>, vector<1x128xf32>
    %93 = vector.broadcast %92 : vector<1x128xf32> to vector<128x128xf32>
    %94 = arith.mulf %91, %93 : vector<128x128xf32>
    %cst_59 = arith.constant dense<0.000000e+00> : vector<128xf32>
    %95 = vector.multi_reduction <add>, %94, %cst_59 [1] : vector<128x128xf32> to vector<128xf32>
    %96 = vector.shape_cast %95 : vector<128xf32> to vector<128x1xf32>
    %c0_60 = arith.constant 0 : index
    %c0_61 = arith.constant 0 : index
    %97 = vector.load %arg5[%c0_60, %c0_61] : memref<1x1xf32, #tpu.memory_space<vmem>>, vector<1x1xf32>
    %98 = vector.broadcast %97 : vector<1x1xf32> to vector<128x1xf32>
    %99 = arith.addf %96, %98 : vector<128x1xf32>
    %c0_62 = arith.constant 0 : index
    %c0_63 = arith.constant 0 : index
    %100 = vector.load %arg6[%c0_62, %c0_63] : memref<128x1xf32, #tpu.memory_space<vmem>>, vector<128x1xf32>
    tpu.vector_store %arg6[%c0_62, %c0_63], %99 {strides = array<i32>} : memref<128x1xf32, #tpu.memory_space<vmem>>, vector<128x1xf32>,
    return
  }
  func.func @transform_0(%arg0: i32) -> (i32, i32) {
    %c0_i32 = arith.constant 0 : i32
    %c0_i32_0 = arith.constant 0 : i32
    return %arg0, %c0_i32 : i32, i32
  }
  func.func @transform_1(%arg0: i32) -> (i32, i32, i32) {
    %c0_i32 = arith.constant 0 : i32
    %c0_i32_0 = arith.constant 0 : i32
    %c0_i32_1 = arith.constant 0 : i32
    %c0_i32_2 = arith.constant 0 : i32
    return %c0_i32, %c0_i32_0, %c0_i32_1 : i32, i32, i32
  }
  func.func @transform_2(%arg0: i32) -> (i32, i32, i32) {
    %c0_i32 = arith.constant 0 : i32
    %c0_i32_0 = arith.constant 0 : i32
    %c0_i32_1 = arith.constant 0 : i32
    %c0_i32_2 = arith.constant 0 : i32
    return %c0_i32, %c0_i32_0, %c0_i32_1 : i32, i32, i32
  }
  func.func @transform_3(%arg0: i32) -> (i32, i32) {
    %c0_i32 = arith.constant 0 : i32
    %c0_i32_0 = arith.constant 0 : i32
    %c0_i32_1 = arith.constant 0 : i32
    return %c0_i32, %c0_i32_0 : i32, i32
  }
  func.func @transform_4(%arg0: i32) -> (i32, i32) {
    %c0_i32 = arith.constant 0 : i32
    %c0_i32_0 = arith.constant 0 : i32
    %c0_i32_1 = arith.constant 0 : i32
    return %c0_i32, %c0_i32_0 : i32, i32
  }
  func.func @transform_5(%arg0: i32) -> (i32, i32) {
    %c0_i32 = arith.constant 0 : i32
    %c0_i32_0 = arith.constant 0 : i32
    return %arg0, %c0_i32 : i32, i32
  }
}

</mosaic_0001>

<bundles_post_ra>
// kernel: tpu_custom_call.1
= control target key start
LH: loop header
LB: loop body
LE: loop exit
PB: predicated region body
PF: predicated region fallthrough
CT: control target
= control target key end

     0   :  { %s2063_s0 = inlined_call_operand.hbm [shape: f32[128,128], index: 0, kind: input, shape index: {}]   ;;  %s2064_s1 = inlined_call_operand.hbm [shape: bf16[7,128,128], index: 1, kind: input, shape index: {}]   ;;  %s2065_s2 = inlined_call_operand.hbm [shape: f32[7,1,128], index: 2, kind: input, shape index: {}]   ;;  %s2066_s3 = inlined_call_operand.vmem [shape: f32[1,128], index: 3, kind: input, shape index: {}]   ;;  %s2067_s4 = inlined_call_operand.<no memory space> [shape: f32[1,1], index: 4, kind: input, shape index: {}]   ;;  %s2068_s5 = inlined_call_operand.vmem [shape: f32[128,1], index: 5, kind: output, shape index: {}]  }
   0x1   :  { %v10_v0 = vstv %s2067_s4 }
   0x2   :  { %11 = vst [vmem:[#allocation2] sm:$0x1] %v10_v0 }
   0x3   :  { %12 = vsyncpa [#allocation4], 0 }
   0x4   :  { %13 = vsyncpa [#allocation6], 0  ;;  %s31_s22 = sshll.u32 %s2064_s1, 4  ;;  %s1801_s23 = smov [#allocation5]   ;;  %s32_s22 = int_to_ptr.hbm [resolvable:$true] %s31_s22 }
   0x5   :  { %s33_s24 = sshll.u32 %s1801_s23, 4  ;;  %s18_s27 = sshll.u32 %s2063_s0, 4  ;;  %s34_s24 = int_to_ptr.vmem [resolvable:$true] %s33_s24  ;;  %s19_s27 = int_to_ptr.hbm [resolvable:$true] %s18_s27 }
   0x6   :  { %s1802_s28 = smov 64   ;;  %s1803_s29 = smov 4  }
   0x7   :  { %39 = dma.hbm_to_vmem [thread:$0]  %s32_s22, 7168, %s34_s24, [#allocation6], %s1802_s28, %s1802_s28, %s1803_s29  }
   0x8   :  { %s1804_s4 = smov [#allocation3]   ;;  %s1805_s6 = smov 128  }
   0x9   :  { %s20_s30 = sshll.u32 %s1804_s4, 4  ;;  %s1806_s7 = smov 8   ;;  %s21_s30 = int_to_ptr.vmem [resolvable:$true] %s20_s30 }
   0xa   :  { %26 = dma.hbm_to_vmem [thread:$0]  %s19_s27, 2048, %s21_s30, [#allocation4], %s1805_s6, %s1805_s6, %s1806_s7  }
   0xb   :  { %s44_s9 = sshll.u32 %s2065_s2, 4  ;;  %s1807_s10 = smov [#allocation7]   ;;  %s45_s9 = int_to_ptr.hbm [resolvable:$true] %s44_s9 }
   0xc   :  { %s46_s11 = sshll.u32 %s1807_s10, 4  ;;  %s1808_s12 = smov 16   ;;  %s47_s11 = int_to_ptr.vmem [resolvable:$true] %s46_s11 }
   0xd   :  { %s1809_s0 = smov 1  }
   0xe   :  { %52 = dma.hbm_to_vmem [thread:$0]  %s45_s9, 112, %s47_s11, [#allocation6], %s1808_s12, %s1808_s12, %s1809_s0  }
   0xf   :  { %1797 = dma.done.wait [#allocation4], 2048  }
  0x10   :  { %1798 = vsyncadd [#allocation4], 4294965248 }
  0x11   :  { %1799 = dma.done.wait [#allocation6], 7280  }
  0x12   :  { %1800 = vsyncadd [#allocation6], 4294960016  ;;  %v1634_v1 = vld [vmem:[#allocation5 + $0x38] sm:$0xff]  ;;  %v1633_v2 = vld [vmem:[#allocation5 + $0x30] sm:$0xff] }
  0x13   :  { %161 = vmatpush.bf16.msra.mxu0 %v1634_v1  ;;  %1683 = vmatpush.bf16.msra.mxu3 %v1634_v1  ;;  %v1632_v3 = vld [vmem:[#allocation5 + $0x28] sm:$0xff]  ;;  %v1631_v4 = vld [vmem:[#allocation5 + $0x20] sm:$0xff]  ;;  %v1630_v5 = vld [vmem:[#allocation5 + $0x18] sm:$0xff] }
  0x14   :  { %v1629_v6 = vld [vmem:[#allocation5 + $0x10] sm:$0xff]  ;;  %v1628_v7 = vld [vmem:[#allocation5 + $0x8] sm:$0xff]  ;;  %v1627_v8 = vld [vmem:[#allocation5] sm:$0xff] }
  0x15   :  { %v69_v9 = vld [vmem:[#allocation3] sm:$0xff]  ;;  %v70_v10 = vld [vmem:[#allocation3 + $0x8] sm:$0xff]  ;;  %v71_v15 = vld [vmem:[#allocation3 + $0x10] sm:$0xff] }
  0x16   :  { %v73_v11 = vld [vmem:[#allocation3 + $0x20] sm:$0xff]  ;;  %v74_v12 = vld [vmem:[#allocation3 + $0x28] sm:$0xff]  ;;  %v85_v13 = vpack.c.bf16 %v70_v10, %v69_v9  ;;  %v72_v16 = vld [vmem:[#allocation3 + $0x18] sm:$0xff] }
  0x17   :  { %162 = vmatpush.bf16.msra.mxu0 %v1633_v2  ;;  %1684 = vmatpush.bf16.msra.mxu3 %v1633_v2  ;;  %v87_v14 = vpack.c.bf16 %v74_v12, %v73_v11  ;;  %v75_v17 = vld [vmem:[#allocation3 + $0x30] sm:$0xff]  ;;  %v76_v18 = vld [vmem:[#allocation3 + $0x38] sm:$0xff]  ;;  %v86_v19 = vpack.c.bf16 %v72_v16, %v71_v15  ;;  %v77_v21 = vld [vmem:[#allocation3 + $0x40] sm:$0xff] }
  0x18   :  { %v88_v20 = vpack.c.bf16 %v76_v18, %v75_v17  ;;  %v78_v22 = vld [vmem:[#allocation3 + $0x48] sm:$0xff]  ;;  %v79_v24 = vld [vmem:[#allocation3 + $0x50] sm:$0xff]  ;;  %v80_v25 = vld [vmem:[#allocation3 + $0x58] sm:$0xff] }
  0x19   :  { %v89_v23 = vpack.c.bf16 %v78_v22, %v77_v21  ;;  %v90_v26 = vpack.c.bf16 %v80_v25, %v79_v24  ;;  %v1642_v27 = vld [vmem:[#allocation5 + $0x78] sm:$0xff]  ;;  %v1641_v28 = vld [vmem:[#allocation5 + $0x70] sm:$0xff]  ;;  %v1640_v29 = vld [vmem:[#allocation5 + $0x68] sm:$0xff] }
  0x1a   :  { %1691 = vmatpush.bf16.msra.mxu1 %v1642_v27  ;;  %v81_v30 = vld [vmem:[#allocation3 + $0x60] sm:$0xff]  ;;  %v82_v31 = vld [vmem:[#allocation3 + $0x68] sm:$0xff]  ;;  %v83_v34 = vld [vmem:[#allocation3 + $0x70] sm:$0xff] }
  0x1b   :  { %163 = vmatpush.bf16.msra.mxu0 %v1632_v3  ;;  %1685 = vmatpush.bf16.msra.mxu3 %v1632_v3  ;;  %v1639_v32 = vld [vmem:[#allocation5 + $0x60] sm:$0xff]  ;;  %v91_v33 = vpack.c.bf16 %v82_v31, %v81_v30  ;;  %v84_v35 = vld [vmem:[#allocation3 + $0x78] sm:$0xff]  ;;  %v1637_v38 = vld [vmem:[#allocation5 + $0x50] sm:$0xff] }
  0x1c   :  { %v92_v36 = vpack.c.bf16 %v84_v35, %v83_v34  ;;  %v1638_v37 = vld [vmem:[#allocation5 + $0x58] sm:$0xff]  ;;  %v1636_v39 = vld [vmem:[#allocation5 + $0x48] sm:$0xff]  ;;  %v1635_v40 = vld [vmem:[#allocation5 + $0x40] sm:$0xff] }
  0x1d   :  { %v1852_v42 = vld [vmem:[#allocation7] ss:$0 sm:$0xff]  ;;  %v1649_v34 = vld [vmem:[#allocation5 + $0xb0] sm:$0xff] }
  0x1e   :  { %1692 = vmatpush.bf16.msra.mxu1 %v1641_v28 }
  0x1f   :  { %164 = vmatpush.bf16.msra.mxu0 %v1631_v4  ;;  %1686 = vmatpush.bf16.msra.mxu3 %v1631_v4 }
  0x22   :  { %1693 = vmatpush.bf16.msra.mxu1 %v1640_v29 }
  0x23   :  { %165 = vmatpush.bf16.msra.mxu0 %v1630_v5  ;;  %1687 = vmatpush.bf16.msra.mxu3 %v1630_v5 }
  0x26   :  { %1694 = vmatpush.bf16.msra.mxu1 %v1639_v32 }
  0x27   :  { %166 = vmatpush.bf16.msra.mxu0 %v1629_v6  ;;  %1688 = vmatpush.bf16.msra.mxu3 %v1629_v6 }
  0x2a   :  { %1695 = vmatpush.bf16.msra.mxu1 %v1638_v37 }
  0x2b   :  { %167 = vmatpush.bf16.msra.mxu0 %v1628_v7  ;;  %1689 = vmatpush.bf16.msra.mxu3 %v1628_v7 }
  0x2e   :  { %1696 = vmatpush.bf16.msra.mxu1 %v1637_v38 }
  0x2f   :  { %168 = vmatpush.bf16.msra.mxu0 %v1627_v8  ;;  %1690 = vmatpush.bf16.msra.mxu3 %v1627_v8 }
  0x32   :  { %169 = vmatmul.bf16.vlgmr.msra.gmra.mxu0 %v85_v13  ;;  %179 = vmatmul.bf16.vlgmr.msra.gmra.mxu3 %v87_v14 }
  0x33   :  { %336 = vmatpush.bf16.msrb.mxu0 %v1642_v27  ;;  %1697 = vmatpush.bf16.msra.mxu1 %v1636_v39 }
  0x37   :  { %337 = vmatpush.bf16.msrb.mxu0 %v1641_v28  ;;  %1698 = vmatpush.bf16.msra.mxu1 %v1635_v40 }
  0x3b   :  { %338 = vmatpush.bf16.msrb.mxu0 %v1640_v29 }
  0x3f   :  { %339 = vmatpush.bf16.msrb.mxu0 %v1639_v32 }
  0x42   :  { %174 = vmatmul.bf16.gmra.mxu0 %v86_v19  ;;  %184 = vmatmul.bf16.gmra.mxu3 %v88_v20 }
  0x43   :  { %340 = vmatpush.bf16.msrb.mxu0 %v1638_v37 }
  0x47   :  { %341 = vmatpush.bf16.msrb.mxu0 %v1637_v38 }
  0x4b   :  { %342 = vmatpush.bf16.msrb.mxu0 %v1636_v39 }
  0x4f   :  { %343 = vmatpush.bf16.msrb.mxu0 %v1635_v40  ;;  %v1647_v40 = vld [vmem:[#allocation5 + $0xa0] sm:$0xff] }
  0x52   :  { %189 = vmatmul.bf16.gmra.mxu3 %v89_v23 }
  0x62   :  { %194 = vmatmul.bf16.gmra.mxu3 %v90_v26 }
  0x72   :  { %199 = vmatmul.bf16.gmra.mxu3 %v91_v33  ;;  %v1650_v33 = vld [vmem:[#allocation5 + $0xb8] sm:$0xff] }
  0x73   :  { %511 = vmatpush.bf16.msra.mxu0 %v1650_v33  ;;  %1699 = vmatpush.bf16.msra.mxu2 %v1650_v33 }
  0x77   :  { %512 = vmatpush.bf16.msra.mxu0 %v1649_v34  ;;  %1700 = vmatpush.bf16.msra.mxu2 %v1649_v34  ;;  %v1657_v34 = vld [vmem:[#allocation5 + $0xf0] sm:$0xff] }
  0x82   :  { %204 = vmatmul.bf16.gmra.mxu3 %v92_v36  ;;  %v1648_v36 = vld [vmem:[#allocation5 + $0xa8] sm:$0xff] }
  0x83   :  { %513 = vmatpush.bf16.msra.mxu0 %v1648_v36  ;;  %1701 = vmatpush.bf16.msra.mxu2 %v1648_v36 }
  0x87   :  { %514 = vmatpush.bf16.msra.mxu0 %v1647_v40  ;;  %1702 = vmatpush.bf16.msra.mxu2 %v1647_v40  ;;  %v1656_v40 = vld [vmem:[#allocation5 + $0xe8] sm:$0xff] }
  0xaf   :  { %v170_v41 = vpop.f32.mrf.mxu0 }
  0xb0   :  { %v171_v43 = vadd.f32 %v1852_v42, %v170_v41 }
  0xb2   :  { %v226_v46 = vmul.f32 0.2, %v171_v43  ;;  %vm210_vm0 = vcmp.ge.f32.partialorder %v171_v43, 0.0 }
  0xb4   :  { %v242_v51 = vsel %vm210_vm0, %v171_v43, %v226_v46 }
  0xb5   :  { %v180_v44 = vpop.f32.mrf.mxu3 }
  0xb6   :  { %v181_v47 = vadd.f32 %v1852_v42, %v180_v44 }
  0xb7   :  { %v172_v45 = vpop.f32.mrf.mxu0 }
  0xb8   :  { %v173_v48 = vadd.f32 %v1852_v42, %v172_v45  ;;  %v230_v50 = vmul.f32 0.2, %v181_v47  ;;  %vm214_vm2 = vcmp.ge.f32.partialorder %v181_v47, 0.0 }
  0xba   :  { %vm211_vm1 = vcmp.ge.f32.partialorder %v173_v48, 0.0  ;;  %v227_v49 = vmul.f32 0.2, %v173_v48  ;;  %v246_v58 = vsel %vm214_vm2, %v181_v47, %v230_v50 }
  0xbc   :  { %v243_v52 = vsel %vm211_vm1, %v173_v48, %v227_v49 }
  0xbd   :  { %v182_v53 = vpop.f32.mrf.mxu3  ;;  %v258_v54 = vpack.c.bf16 %v243_v52, %v242_v51 }
  0xbe   :  { %v183_v55 = vadd.f32 %v1852_v42, %v182_v53 }
  0xbf   :  { %v175_v56 = vpop.f32.mrf.mxu0  ;;  %344 = vmatmul.bf16.vlgmr.msrb.gmra.mxu0 %v258_v54 }
  0xc0   :  { %v231_v57 = vmul.f32 0.2, %v183_v55  ;;  %vm215_vm3 = vcmp.ge.f32.partialorder %v183_v55, 0.0  ;;  %v176_v61 = vadd.f32 %v1852_v42, %v175_v56  ;;  %v1645_v56 = vld [vmem:[#allocation5 + $0x90] sm:$0xff] }
  0xc2   :  { %v247_v59 = vsel %vm215_vm3, %v183_v55, %v231_v57  ;;  %v228_v0 = vmul.f32 0.2, %v176_v61  ;;  %vm212_vm4 = vcmp.ge.f32.partialorder %v176_v61, 0.0  ;;  %v1646_v55 = vld [vmem:[#allocation5 + $0x98] sm:$0xff]  ;;  %v1644_v57 = vld [vmem:[#allocation5 + $0x88] sm:$0xff] }
  0xc3   :  { %v260_v60 = vpack.c.bf16 %v247_v59, %v246_v58  ;;  %515 = vmatpush.bf16.msra.mxu0 %v1646_v55  ;;  %1703 = vmatpush.bf16.msra.mxu2 %v1646_v55  ;;  %v1643_v58 = vld [vmem:[#allocation5 + $0x80] sm:$0xff]  ;;  %v1654_v55 = vld [vmem:[#allocation5 + $0xd8] sm:$0xff] }
  0xc4   :  { %v244_v5 = vsel %vm212_vm4, %v176_v61, %v228_v0 }
  0xc5   :  { %v185_v62 = vpop.f32.mrf.mxu3  ;;  %354 = vmatmul.bf16.vlgmr.msra.gmra.mxu1 %v260_v60 }
  0xc6   :  { %v186_v1 = vadd.f32 %v1852_v42, %v185_v62 }
  0xc7   :  { %v177_v63 = vpop.f32.mrf.mxu0  ;;  %516 = vmatpush.bf16.msra.mxu0 %v1645_v56  ;;  %1704 = vmatpush.bf16.msra.mxu2 %v1645_v56  ;;  %v1653_v56 = vld [vmem:[#allocation5 + $0xd0] sm:$0xff] }
  0xc8   :  { %v178_v2 = vadd.f32 %v1852_v42, %v177_v63  ;;  %v232_v4 = vmul.f32 0.2, %v186_v1  ;;  %vm216_vm6 = vcmp.ge.f32.partialorder %v186_v1, 0.0 }
  0xca   :  { %v229_v3 = vmul.f32 0.2, %v178_v2  ;;  %vm213_vm5 = vcmp.ge.f32.partialorder %v178_v2, 0.0  ;;  %v248_v11 = vsel %vm216_vm6, %v186_v1, %v232_v4 }
  0xcb   :  { %517 = vmatpush.bf16.msra.mxu0 %v1644_v57  ;;  %1705 = vmatpush.bf16.msra.mxu2 %v1644_v57 }
  0xcc   :  { %v245_v6 = vsel %vm213_vm5, %v178_v2, %v229_v3 }
  0xcd   :  { %v187_v7 = vpop.f32.mrf.mxu3  ;;  %v259_v8 = vpack.c.bf16 %v245_v6, %v244_v5 }
  0xce   :  { %v188_v9 = vadd.f32 %v1852_v42, %v187_v7 }
  0xcf   :  { %349 = vmatmul.bf16.gmra.mxu0 %v259_v8  ;;  %1706 = vmatpush.bf16.msra.mxu2 %v1643_v58 }
  0xd0   :  { %v233_v10 = vmul.f32 0.2, %v188_v9  ;;  %vm217_vm7 = vcmp.ge.f32.partialorder %v188_v9, 0.0  ;;  %518 = vmatpush.bf16.msra.mxu0 %v1643_v58  ;;  %v1652_v58 = vld [vmem:[#allocation5 + $0xc8] sm:$0xff] }
  0xd2   :  { %v249_v12 = vsel %vm217_vm7, %v188_v9, %v233_v10 }
  0xd3   :  { %v261_v13 = vpack.c.bf16 %v249_v12, %v248_v11 }
  0xd5   :  { %v190_v14 = vpop.f32.mrf.mxu3  ;;  %359 = vmatmul.bf16.gmra.mxu1 %v261_v13 }
  0xd6   :  { %v191_v15 = vadd.f32 %v1852_v42, %v190_v14 }
  0xd8   :  { %v234_v16 = vmul.f32 0.2, %v191_v15  ;;  %vm218_vm8 = vcmp.ge.f32.partialorder %v191_v15, 0.0 }
  0xda   :  { %v250_v20 = vsel %vm218_vm8, %v191_v15, %v234_v16 }
  0xdd   :  { %v192_v17 = vpop.f32.mrf.mxu3 }
  0xde   :  { %v193_v18 = vadd.f32 %v1852_v42, %v192_v17 }
  0xe0   :  { %v235_v19 = vmul.f32 0.2, %v193_v18  ;;  %vm219_vm9 = vcmp.ge.f32.partialorder %v193_v18, 0.0 }
  0xe2   :  { %v251_v21 = vsel %vm219_vm9, %v193_v18, %v235_v19 }
  0xe3   :  { %v262_v22 = vpack.c.bf16 %v251_v21, %v250_v20  ;;  %v1658_v20 = vld [vmem:[#allocation5 + $0xf8] sm:$0xff] }
  0xe4   :  { %686 = vmatpush.bf16.msrb.mxu3 %v1658_v20 }
  0xe5   :  { %v195_v23 = vpop.f32.mrf.mxu3  ;;  %364 = vmatmul.bf16.gmra.mxu1 %v262_v22 }
  0xe6   :  { %v196_v24 = vadd.f32 %v1852_v42, %v195_v23 }
  0xe8   :  { %v236_v25 = vmul.f32 0.2, %v196_v24  ;;  %vm220_vm10 = vcmp.ge.f32.partialorder %v196_v24, 0.0  ;;  %687 = vmatpush.bf16.msrb.mxu3 %v1657_v34 }
  0xea   :  { %v252_v29 = vsel %vm220_vm10, %v196_v24, %v236_v25 }
  0xec   :  { %688 = vmatpush.bf16.msrb.mxu3 %v1656_v40 }
  0xed   :  { %v197_v26 = vpop.f32.mrf.mxu3 }
  0xee   :  { %v198_v27 = vadd.f32 %v1852_v42, %v197_v26 }
  0xf0   :  { %v237_v28 = vmul.f32 0.2, %v198_v27  ;;  %vm221_vm11 = vcmp.ge.f32.partialorder %v198_v27, 0.0 }
  0xf2   :  { %v253_v30 = vsel %vm221_vm11, %v198_v27, %v237_v28 }
  0xf3   :  { %v263_v31 = vpack.c.bf16 %v253_v30, %v252_v29 }
  0xf5   :  { %v200_v32 = vpop.f32.mrf.mxu3  ;;  %369 = vmatmul.bf16.gmra.mxu1 %v263_v31 }
  0xf6   :  { %v201_v35 = vadd.f32 %v1852_v42, %v200_v32 }
  0xf8   :  { %v238_v37 = vmul.f32 0.2, %v201_v35  ;;  %vm222_vm12 = vcmp.ge.f32.partialorder %v201_v35, 0.0 }
  0xfa   :  { %v254_v43 = vsel %vm222_vm12, %v201_v35, %v238_v37 }
  0xfd   :  { %v202_v38 = vpop.f32.mrf.mxu3 }
  0xfe   :  { %v203_v39 = vadd.f32 %v1852_v42, %v202_v38 }
 0x100   :  { %v239_v41 = vmul.f32 0.2, %v203_v39  ;;  %vm223_vm13 = vcmp.ge.f32.partialorder %v203_v39, 0.0 }
 0x102   :  { %v255_v44 = vsel %vm223_vm13, %v203_v39, %v239_v41 }
 0x103   :  { %v264_v45 = vpack.c.bf16 %v255_v44, %v254_v43 }
 0x105   :  { %v205_v46 = vpop.f32.mrf.mxu3  ;;  %374 = vmatmul.bf16.gmra.mxu1 %v264_v45 }
 0x106   :  { %v206_v47 = vadd.f32 %v1852_v42, %v205_v46 }
 0x108   :  { %v240_v48 = vmul.f32 0.2, %v206_v47  ;;  %vm224_vm14 = vcmp.ge.f32.partialorder %v206_v47, 0.0 }
 0x10a   :  { %v256_v52 = vsel %vm224_vm14, %v206_v47, %v240_v48 }
 0x10d   :  { %v207_v49 = vpop.f32.mrf.mxu3 }
 0x10e   :  { %v208_v50 = vadd.f32 %v1852_v42, %v207_v49  ;;  %v1870_v42 = vld [vmem:[#allocation7 + $0x1] ss:$0 sm:$0xff] }
 0x110   :  { %v241_v51 = vmul.f32 0.2, %v208_v50  ;;  %vm225_vm15 = vcmp.ge.f32.partialorder %v208_v50, 0.0 }
 0x112   :  { %v257_v53 = vsel %vm225_vm15, %v208_v50, %v241_v51  ;;  %v1655_v51 = vld [vmem:[#allocation5 + $0xe0] sm:$0xff] }
 0x113   :  { %v265_v54 = vpack.c.bf16 %v257_v53, %v256_v52  ;;  %689 = vmatpush.bf16.msrb.mxu3 %v1655_v51 }
 0x115   :  { %379 = vmatmul.bf16.gmra.mxu1 %v265_v54 }
 0x117   :  { %690 = vmatpush.bf16.msrb.mxu3 %v1654_v55 }
 0x11b   :  { %691 = vmatpush.bf16.msrb.mxu3 %v1653_v56 }
 0x11f   :  { %692 = vmatpush.bf16.msrb.mxu3 %v1652_v58 }
 0x13c   :  { %v345_v59 = vpop.f32.mrf.mxu0 }
 0x13d   :  { %v346_v60 = vadd.f32 %v1870_v42, %v345_v59 }
 0x13f   :  { %v401_v63 = vmul.f32 0.2, %v346_v60  ;;  %vm385_vm0 = vcmp.ge.f32.partialorder %v346_v60, 0.0 }
 0x141   :  { %v417_v3 = vsel %vm385_vm0, %v346_v60, %v401_v63 }
 0x142   :  { %v355_v61 = vpop.f32.mrf.mxu1 }
 0x143   :  { %v356_v0 = vadd.f32 %v1870_v42, %v355_v61 }
 0x144   :  { %v347_v62 = vpop.f32.mrf.mxu0 }
 0x145   :  { %v348_v1 = vadd.f32 %v1870_v42, %v347_v62  ;;  %v405_v4 = vmul.f32 0.2, %v356_v0  ;;  %vm389_vm2 = vcmp.ge.f32.partialorder %v356_v0, 0.0 }
 0x147   :  { %vm386_vm1 = vcmp.ge.f32.partialorder %v348_v1, 0.0  ;;  %v402_v2 = vmul.f32 0.2, %v348_v1  ;;  %v421_v11 = vsel %vm389_vm2, %v356_v0, %v405_v4 }
 0x149   :  { %v418_v5 = vsel %vm386_vm1, %v348_v1, %v402_v2 }
 0x14a   :  { %v433_v6 = vpack.c.bf16 %v418_v5, %v417_v3  ;;  %v357_v7 = vpop.f32.mrf.mxu1 }
 0x14b   :  { %v358_v8 = vadd.f32 %v1870_v42, %v357_v7 }
 0x14c   :  { %v350_v9 = vpop.f32.mrf.mxu0  ;;  %519 = vmatmul.bf16.vlgmr.msra.gmra.mxu0 %v433_v6 }
 0x14d   :  { %v406_v10 = vmul.f32 0.2, %v358_v8  ;;  %vm390_vm3 = vcmp.ge.f32.partialorder %v358_v8, 0.0  ;;  %v351_v14 = vadd.f32 %v1870_v42, %v350_v9 }
 0x14f   :  { %v422_v12 = vsel %vm390_vm3, %v358_v8, %v406_v10  ;;  %v403_v17 = vmul.f32 0.2, %v351_v14  ;;  %vm387_vm4 = vcmp.ge.f32.partialorder %v351_v14, 0.0 }
 0x150   :  { %v435_v13 = vpack.c.bf16 %v422_v12, %v421_v11  ;;  %v1651_v11 = vld [vmem:[#allocation5 + $0xc0] sm:$0xff] }
 0x151   :  { %v419_v23 = vsel %vm387_vm4, %v351_v14, %v403_v17  ;;  %693 = vmatpush.bf16.msrb.mxu3 %v1651_v11 }
 0x152   :  { %v360_v15 = vpop.f32.mrf.mxu1  ;;  %529 = vmatmul.bf16.vlgmr.msra.gmra.mxu2 %v435_v13  ;;  %v1888_v13 = vld [vmem:[#allocation7 + $0x2] ss:$0 sm:$0xff] }
 0x153   :  { %v361_v18 = vadd.f32 %v1870_v42, %v360_v15 }
 0x154   :  { %v352_v16 = vpop.f32.mrf.mxu0 }
 0x155   :  { %v353_v19 = vadd.f32 %v1870_v42, %v352_v16  ;;  %v407_v22 = vmul.f32 0.2, %v361_v18  ;;  %vm391_vm6 = vcmp.ge.f32.partialorder %v361_v18, 0.0 }
 0x157   :  { %v404_v21 = vmul.f32 0.2, %v353_v19  ;;  %vm388_vm5 = vcmp.ge.f32.partialorder %v353_v19, 0.0  ;;  %v423_v29 = vsel %vm391_vm6, %v361_v18, %v407_v22 }
 0x159   :  { %v420_v24 = vsel %vm388_vm5, %v353_v19, %v404_v21 }
 0x15a   :  { %v362_v25 = vpop.f32.mrf.mxu1  ;;  %v434_v26 = vpack.c.bf16 %v420_v24, %v419_v23 }
 0x15b   :  { %v363_v27 = vadd.f32 %v1870_v42, %v362_v25 }
 0x15c   :  { %524 = vmatmul.bf16.gmra.mxu0 %v434_v26 }
 0x15d   :  { %v408_v28 = vmul.f32 0.2, %v363_v27  ;;  %vm392_vm7 = vcmp.ge.f32.partialorder %v363_v27, 0.0 }
 0x15f   :  { %v424_v30 = vsel %vm392_vm7, %v363_v27, %v408_v28 }
 0x160   :  { %v436_v31 = vpack.c.bf16 %v424_v30, %v423_v29 }
 0x162   :  { %v365_v32 = vpop.f32.mrf.mxu1  ;;  %534 = vmatmul.bf16.gmra.mxu2 %v436_v31 }
 0x163   :  { %v366_v33 = vadd.f32 %v1870_v42, %v365_v32 }
 0x165   :  { %v409_v35 = vmul.f32 0.2, %v366_v33  ;;  %vm393_vm8 = vcmp.ge.f32.partialorder %v366_v33, 0.0 }
 0x167   :  { %v425_v39 = vsel %vm393_vm8, %v366_v33, %v409_v35 }
 0x16a   :  { %v367_v36 = vpop.f32.mrf.mxu1 }
 0x16b   :  { %v368_v37 = vadd.f32 %v1870_v42, %v367_v36 }
 0x16d   :  { %v410_v38 = vmul.f32 0.2, %v368_v37  ;;  %vm394_vm9 = vcmp.ge.f32.partialorder %v368_v37, 0.0 }
 0x16f   :  { %v426_v41 = vsel %vm394_vm9, %v368_v37, %v410_v38 }
 0x170   :  { %v437_v43 = vpack.c.bf16 %v426_v41, %v425_v39 }
 0x172   :  { %v370_v44 = vpop.f32.mrf.mxu1  ;;  %539 = vmatmul.bf16.gmra.mxu2 %v437_v43 }
 0x173   :  { %v371_v45 = vadd.f32 %v1870_v42, %v370_v44 }
 0x175   :  { %v411_v46 = vmul.f32 0.2, %v371_v45  ;;  %vm395_vm10 = vcmp.ge.f32.partialorder %v371_v45, 0.0 }
 0x177   :  { %v427_v50 = vsel %vm395_vm10, %v371_v45, %v411_v46 }
 0x17a   :  { %v372_v47 = vpop.f32.mrf.mxu1 }
 0x17b   :  { %v373_v48 = vadd.f32 %v1870_v42, %v372_v47 }
 0x17d   :  { %v412_v49 = vmul.f32 0.2, %v373_v48  ;;  %vm396_vm11 = vcmp.ge.f32.partialorder %v373_v48, 0.0 }
 0x17f   :  { %v428_v52 = vsel %vm396_vm11, %v373_v48, %v412_v49 }
 0x180   :  { %v438_v53 = vpack.c.bf16 %v428_v52, %v427_v50 }
 0x182   :  { %v375_v54 = vpop.f32.mrf.mxu1  ;;  %544 = vmatmul.bf16.gmra.mxu2 %v438_v53 }
 0x183   :  { %v376_v57 = vadd.f32 %v1870_v42, %v375_v54 }
 0x185   :  { %v413_v59 = vmul.f32 0.2, %v376_v57  ;;  %vm397_vm12 = vcmp.ge.f32.partialorder %v376_v57, 0.0 }
 0x187   :  { %v429_v63 = vsel %vm397_vm12, %v376_v57, %v413_v59 }
 0x18a   :  { %v377_v60 = vpop.f32.mrf.mxu1 }
 0x18b   :  { %v378_v61 = vadd.f32 %v1870_v42, %v377_v60 }
 0x18d   :  { %v414_v62 = vmul.f32 0.2, %v378_v61  ;;  %vm398_vm13 = vcmp.ge.f32.partialorder %v378_v61, 0.0 }
 0x18f   :  { %v430_v0 = vsel %vm398_vm13, %v378_v61, %v414_v62 }
 0x190   :  { %v439_v1 = vpack.c.bf16 %v430_v0, %v429_v63 }
 0x192   :  { %v380_v2 = vpop.f32.mrf.mxu1  ;;  %549 = vmatmul.bf16.gmra.mxu2 %v439_v1 }
 0x193   :  { %v381_v3 = vadd.f32 %v1870_v42, %v380_v2 }
 0x195   :  { %v415_v4 = vmul.f32 0.2, %v381_v3  ;;  %vm399_vm14 = vcmp.ge.f32.partialorder %v381_v3, 0.0 }
 0x197   :  { %v431_v8 = vsel %vm399_vm14, %v381_v3, %v415_v4 }
 0x19a   :  { %v382_v5 = vpop.f32.mrf.mxu1 }
 0x19b   :  { %v383_v6 = vadd.f32 %v1870_v42, %v382_v5  ;;  %v1666_v5 = vld [vmem:[#allocation5 + $0x138] sm:$0xff] }
 0x19c   :  { %861 = vmatpush.bf16.msrb.mxu0 %v1666_v5 }
 0x19d   :  { %v416_v7 = vmul.f32 0.2, %v383_v6  ;;  %vm400_vm15 = vcmp.ge.f32.partialorder %v383_v6, 0.0 }
 0x19f   :  { %v432_v9 = vsel %vm400_vm15, %v383_v6, %v416_v7  ;;  %v1665_v6 = vld [vmem:[#allocation5 + $0x130] sm:$0xff] }
 0x1a0   :  { %v440_v10 = vpack.c.bf16 %v432_v9, %v431_v8  ;;  %862 = vmatpush.bf16.msrb.mxu0 %v1665_v6  ;;  %v1671_v6 = vld [vmem:[#allocation5 + $0x160] sm:$0xff] }
 0x1a2   :  { %554 = vmatmul.bf16.gmra.mxu2 %v440_v10  ;;  %v1664_v10 = vld [vmem:[#allocation5 + $0x128] sm:$0xff] }
 0x1a4   :  { %863 = vmatpush.bf16.msrb.mxu0 %v1664_v10 }
 0x1c9   :  { %v520_v12 = vpop.f32.mrf.mxu0 }
 0x1ca   :  { %v521_v14 = vadd.f32 %v1888_v13, %v520_v12 }
 0x1cc   :  { %v576_v16 = vmul.f32 0.2, %v521_v14  ;;  %vm560_vm0 = vcmp.ge.f32.partialorder %v521_v14, 0.0 }
 0x1ce   :  { %v592_v19 = vsel %vm560_vm0, %v521_v14, %v576_v16  ;;  %v1663_v14 = vld [vmem:[#allocation5 + $0x120] sm:$0xff] }
 0x1cf   :  { %864 = vmatpush.bf16.msrb.mxu0 %v1663_v14 }
 0x1d1   :  { %v522_v15 = vpop.f32.mrf.mxu0 }
 0x1d2   :  { %v523_v17 = vadd.f32 %v1888_v13, %v522_v15 }
 0x1d4   :  { %vm561_vm1 = vcmp.ge.f32.partialorder %v523_v17, 0.0  ;;  %v577_v42 = vmul.f32 0.2, %v523_v17 }
 0x1d5   :  { %v530_v18 = vpop.f32.mrf.mxu2 }
 0x1d6   :  { %v593_v20 = vsel %vm561_vm1, %v523_v17, %v577_v42  ;;  %v531_v35 = vadd.f32 %v1888_v13, %v530_v18  ;;  %v1662_v18 = vld [vmem:[#allocation5 + $0x118] sm:$0xff] }
 0x1d7   :  { %v608_v21 = vpack.c.bf16 %v593_v20, %v592_v19  ;;  %865 = vmatpush.bf16.msrb.mxu0 %v1662_v18 }
 0x1d8   :  { %v580_v37 = vmul.f32 0.2, %v531_v35  ;;  %vm564_vm5 = vcmp.ge.f32.partialorder %v531_v35, 0.0 }
 0x1d9   :  { %v525_v22 = vpop.f32.mrf.mxu0  ;;  %694 = vmatmul.bf16.vlgmr.msrb.gmra.mxu3 %v608_v21  ;;  %v1661_v21 = vld [vmem:[#allocation5 + $0x110] sm:$0xff] }
 0x1da   :  { %v526_v24 = vadd.f32 %v1888_v13, %v525_v22  ;;  %v596_v40 = vsel %vm564_vm5, %v531_v35, %v580_v37 }
 0x1db   :  { %866 = vmatpush.bf16.msrb.mxu0 %v1661_v21 }
 0x1dc   :  { %v578_v26 = vmul.f32 0.2, %v526_v24  ;;  %vm562_vm2 = vcmp.ge.f32.partialorder %v526_v24, 0.0 }
 0x1dd   :  { %v532_v23 = vpop.f32.mrf.mxu2 }
 0x1de   :  { %v594_v30 = vsel %vm562_vm2, %v526_v24, %v578_v26  ;;  %v533_v33 = vadd.f32 %v1888_v13, %v532_v23  ;;  %v1660_v24 = vld [vmem:[#allocation5 + $0x108] sm:$0xff] }
 0x1df   :  { %867 = vmatpush.bf16.msrb.mxu0 %v1660_v24 }
 0x1e0   :  { %v581_v36 = vmul.f32 0.2, %v533_v33  ;;  %vm565_vm4 = vcmp.ge.f32.partialorder %v533_v33, 0.0 }
 0x1e1   :  { %v527_v25 = vpop.f32.mrf.mxu0 }
 0x1e2   :  { %v528_v27 = vadd.f32 %v1888_v13, %v527_v25  ;;  %v597_v38 = vsel %vm565_vm4, %v533_v33, %v581_v36 }
 0x1e3   :  { %v610_v41 = vpack.c.bf16 %v597_v38, %v596_v40 }
 0x1e4   :  { %v579_v28 = vmul.f32 0.2, %v528_v27  ;;  %vm563_vm3 = vcmp.ge.f32.partialorder %v528_v27, 0.0 }
 0x1e5   :  { %v535_v29 = vpop.f32.mrf.mxu2 }
 0x1e6   :  { %v595_v31 = vsel %vm563_vm3, %v528_v27, %v579_v28  ;;  %v536_v45 = vadd.f32 %v1888_v13, %v535_v29  ;;  %v1659_v28 = vld [vmem:[#allocation5 + $0x100] sm:$0xff] }
 0x1e7   :  { %v609_v32 = vpack.c.bf16 %v595_v31, %v594_v30  ;;  %868 = vmatpush.bf16.msrb.mxu0 %v1659_v28  ;;  %v1906_v30 = vld [vmem:[#allocation7 + $0x3] ss:$0 sm:$0xff] }
 0x1e8   :  { %v582_v47 = vmul.f32 0.2, %v536_v45  ;;  %vm566_vm7 = vcmp.ge.f32.partialorder %v536_v45, 0.0 }
 0x1e9   :  { %699 = vmatmul.bf16.gmra.mxu3 %v609_v32 }
 0x1ea   :  { %v598_v49 = vsel %vm566_vm7, %v536_v45, %v582_v47  ;;  %v1674_v45 = vld [vmem:[#allocation5 + $0x178] sm:$0xff] }
 0x1eb   :  { %1036 = vmatpush.bf16.msrb.mxu1 %v1674_v45 }
 0x1ed   :  { %v537_v34 = vpop.f32.mrf.mxu2 }
 0x1ee   :  { %v538_v43 = vadd.f32 %v1888_v13, %v537_v34 }
 0x1f0   :  { %v583_v46 = vmul.f32 0.2, %v538_v43  ;;  %vm567_vm6 = vcmp.ge.f32.partialorder %v538_v43, 0.0 }
 0x1f2   :  { %v599_v48 = vsel %vm567_vm6, %v538_v43, %v583_v46 }
 0x1f3   :  { %v611_v51 = vpack.c.bf16 %v599_v48, %v598_v49 }
 0x1f5   :  { %v540_v39 = vpop.f32.mrf.mxu2 }
 0x1f6   :  { %v541_v53 = vadd.f32 %v1888_v13, %v540_v39 }
 0x1f8   :  { %v584_v56 = vmul.f32 0.2, %v541_v53  ;;  %vm568_vm9 = vcmp.ge.f32.partialorder %v541_v53, 0.0 }
 0x1f9   :  { %704 = vmatmul.bf16.gmra.mxu3 %v610_v41 }
 0x1fa   :  { %v600_v58 = vsel %vm568_vm9, %v541_v53, %v584_v56 }
 0x1fd   :  { %v542_v44 = vpop.f32.mrf.mxu2 }
 0x1fe   :  { %v543_v52 = vadd.f32 %v1888_v13, %v542_v44 }
 0x200   :  { %v585_v54 = vmul.f32 0.2, %v543_v52  ;;  %vm569_vm8 = vcmp.ge.f32.partialorder %v543_v52, 0.0 }
 0x202   :  { %v601_v57 = vsel %vm569_vm8, %v543_v52, %v585_v54 }
 0x203   :  { %v612_v59 = vpack.c.bf16 %v601_v57, %v600_v58 }
 0x205   :  { %v545_v50 = vpop.f32.mrf.mxu2 }
 0x206   :  { %v546_v62 = vadd.f32 %v1888_v13, %v545_v50 }
 0x208   :  { %v586_v0 = vmul.f32 0.2, %v546_v62  ;;  %vm570_vm11 = vcmp.ge.f32.partialorder %v546_v62, 0.0 }
 0x209   :  { %709 = vmatmul.bf16.gmra.mxu3 %v611_v51 }
 0x20a   :  { %v602_v3 = vsel %vm570_vm11, %v546_v62, %v586_v0 }
 0x20d   :  { %v547_v55 = vpop.f32.mrf.mxu2 }
 0x20e   :  { %v548_v61 = vadd.f32 %v1888_v13, %v547_v55  ;;  %v1673_v55 = vld [vmem:[#allocation5 + $0x170] sm:$0xff] }
 0x20f   :  { %1037 = vmatpush.bf16.msrb.mxu1 %v1673_v55 }
 0x210   :  { %v587_v63 = vmul.f32 0.2, %v548_v61  ;;  %vm571_vm10 = vcmp.ge.f32.partialorder %v548_v61, 0.0 }
 0x212   :  { %v603_v1 = vsel %vm571_vm10, %v548_v61, %v587_v63 }
 0x213   :  { %v613_v4 = vpack.c.bf16 %v603_v1, %v602_v3 }
 0x215   :  { %v550_v60 = vpop.f32.mrf.mxu2 }
 0x216   :  { %v551_v8 = vadd.f32 %v1888_v13, %v550_v60  ;;  %v1672_v60 = vld [vmem:[#allocation5 + $0x168] sm:$0xff] }
 0x217   :  { %1038 = vmatpush.bf16.msrb.mxu1 %v1672_v60 }
 0x218   :  { %v588_v12 = vmul.f32 0.2, %v551_v8  ;;  %vm572_vm13 = vcmp.ge.f32.partialorder %v551_v8, 0.0 }
 0x219   :  { %714 = vmatmul.bf16.gmra.mxu3 %v612_v59 }
 0x21a   :  { %v604_v16 = vsel %vm572_vm13, %v551_v8, %v588_v12  ;;  %v1670_v12 = vld [vmem:[#allocation5 + $0x158] sm:$0xff] }
 0x21b   :  { %1039 = vmatpush.bf16.msrb.mxu1 %v1671_v6 }
 0x21d   :  { %v552_v2 = vpop.f32.mrf.mxu2 }
 0x21e   :  { %v553_v7 = vadd.f32 %v1888_v13, %v552_v2 }
 0x21f   :  { %1040 = vmatpush.bf16.msrb.mxu1 %v1670_v12 }
 0x220   :  { %v589_v11 = vmul.f32 0.2, %v553_v7  ;;  %vm573_vm12 = vcmp.ge.f32.partialorder %v553_v7, 0.0 }
 0x222   :  { %v605_v15 = vsel %vm573_vm12, %v553_v7, %v589_v11 }
 0x223   :  { %v614_v17 = vpack.c.bf16 %v605_v15, %v604_v16 }
 0x225   :  { %v555_v9 = vpop.f32.mrf.mxu2 }
 0x226   :  { %v556_v20 = vadd.f32 %v1888_v13, %v555_v9 }
 0x228   :  { %v590_v23 = vmul.f32 0.2, %v556_v20  ;;  %vm574_vm15 = vcmp.ge.f32.partialorder %v556_v20, 0.0 }
 0x229   :  { %719 = vmatmul.bf16.gmra.mxu3 %v613_v4 }
 0x22a   :  { %v606_v26 = vsel %vm574_vm15, %v556_v20, %v590_v23 }
 0x22d   :  { %v557_v42 = vpop.f32.mrf.mxu2 }
 0x22e   :  { %v558_v19 = vadd.f32 %v1888_v13, %v557_v42 }
 0x230   :  { %v591_v22 = vmul.f32 0.2, %v558_v19  ;;  %vm575_vm14 = vcmp.ge.f32.partialorder %v558_v19, 0.0 }
 0x232   :  { %v607_v25 = vsel %vm575_vm14, %v558_v19, %v591_v22  ;;  %v1669_v22 = vld [vmem:[#allocation5 + $0x150] sm:$0xff] }
 0x233   :  { %v615_v27 = vpack.c.bf16 %v607_v25, %v606_v26  ;;  %1041 = vmatpush.bf16.msrb.mxu1 %v1669_v22 }
 0x239   :  { %724 = vmatmul.bf16.gmra.mxu3 %v614_v17 }
 0x249   :  { %729 = vmatmul.bf16.gmra.mxu3 %v615_v27  ;;  %v1668_v27 = vld [vmem:[#allocation5 + $0x148] sm:$0xff] }
 0x24a   :  { %1042 = vmatpush.bf16.msrb.mxu1 %v1668_v27 }
 0x25c   :  { %v695_v29 = vpop.f32.mrf.mxu3 }
 0x25d   :  { %v696_v31 = vadd.f32 %v1906_v30, %v695_v29 }
 0x25f   :  { %v751_v32 = vmul.f32 0.2, %v696_v31  ;;  %vm735_vm0 = vcmp.ge.f32.partialorder %v696_v31, 0.0 }
 0x261   :  { %v767_v35 = vsel %vm735_vm0, %v696_v31, %v751_v32 }
 0x264   :  { %v697_v13 = vpop.f32.mrf.mxu3 }
 0x265   :  { %v698_v33 = vadd.f32 %v1906_v30, %v697_v13 }
 0x267   :  { %vm736_vm1 = vcmp.ge.f32.partialorder %v698_v33, 0.0  ;;  %v752_v34 = vmul.f32 0.2, %v698_v33 }
 0x269   :  { %v768_v36 = vsel %vm736_vm1, %v698_v33, %v752_v34 }
 0x26a   :  { %v783_v37 = vpack.c.bf16 %v768_v36, %v767_v35 }
 0x26c   :  { %v700_v38 = vpop.f32.mrf.mxu3  ;;  %869 = vmatmul.bf16.vlgmr.msrb.gmra.mxu0 %v783_v37  ;;  %v1667_v37 = vld [vmem:[#allocation5 + $0x140] sm:$0xff] }
 0x26d   :  { %v701_v39 = vadd.f32 %v1906_v30, %v700_v38  ;;  %1043 = vmatpush.bf16.msrb.mxu1 %v1667_v37 }
 0x26f   :  { %v753_v41 = vmul.f32 0.2, %v701_v39  ;;  %vm737_vm2 = vcmp.ge.f32.partialorder %v701_v39, 0.0 }
 0x271   :  { %v769_v46 = vsel %vm737_vm2, %v701_v39, %v753_v41 }
 0x274   :  { %v702_v40 = vpop.f32.mrf.mxu3 }
 0x275   :  { %v703_v43 = vadd.f32 %v1906_v30, %v702_v40 }
 0x277   :  { %v754_v44 = vmul.f32 0.2, %v703_v43  ;;  %vm738_vm3 = vcmp.ge.f32.partialorder %v703_v43, 0.0 }
 0x279   :  { %v770_v47 = vsel %vm738_vm3, %v703_v43, %v754_v44 }
 0x27a   :  { %v784_v48 = vpack.c.bf16 %v770_v47, %v769_v46 }
 0x27c   :  { %v705_v49 = vpop.f32.mrf.mxu3  ;;  %874 = vmatmul.bf16.gmra.mxu0 %v784_v48  ;;  %v1924_v48 = vld [vmem:[#allocation7 + $0x4] ss:$0 sm:$0xff] }
 0x27d   :  { %v706_v50 = vadd.f32 %v1906_v30, %v705_v49 }
 0x27f   :  { %v755_v52 = vmul.f32 0.2, %v706_v50  ;;  %vm739_vm4 = vcmp.ge.f32.partialorder %v706_v50, 0.0 }
 0x281   :  { %v771_v56 = vsel %vm739_vm4, %v706_v50, %v755_v52 }
 0x284   :  { %v707_v51 = vpop.f32.mrf.mxu3 }
 0x285   :  { %v708_v53 = vadd.f32 %v1906_v30, %v707_v51 }
 0x287   :  { %v756_v54 = vmul.f32 0.2, %v708_v53  ;;  %vm740_vm5 = vcmp.ge.f32.partialorder %v708_v53, 0.0 }
 0x289   :  { %v772_v57 = vsel %vm740_vm5, %v708_v53, %v756_v54 }
 0x28a   :  { %v785_v58 = vpack.c.bf16 %v772_v57, %v771_v56 }
 0x28c   :  { %v710_v59 = vpop.f32.mrf.mxu3  ;;  %879 = vmatmul.bf16.gmra.mxu0 %v785_v58 }
 0x28d   :  { %v711_v61 = vadd.f32 %v1906_v30, %v710_v59 }
 0x28f   :  { %v757_v63 = vmul.f32 0.2, %v711_v61  ;;  %vm741_vm6 = vcmp.ge.f32.partialorder %v711_v61, 0.0 }
 0x291   :  { %v773_v2 = vsel %vm741_vm6, %v711_v61, %v757_v63 }
 0x294   :  { %v712_v62 = vpop.f32.mrf.mxu3 }
 0x295   :  { %v713_v0 = vadd.f32 %v1906_v30, %v712_v62  ;;  %v1682_v62 = vld [vmem:[#allocation5 + $0x1b8] sm:$0xff] }
 0x296   :  { %1211 = vmatpush.bf16.msrb.mxu2 %v1682_v62 }
 0x297   :  { %v758_v1 = vmul.f32 0.2, %v713_v0  ;;  %vm742_vm7 = vcmp.ge.f32.partialorder %v713_v0, 0.0 }
 0x299   :  { %v774_v3 = vsel %vm742_vm7, %v713_v0, %v758_v1 }
 0x29a   :  { %v786_v4 = vpack.c.bf16 %v774_v3, %v773_v2 }
 0x29c   :  { %v715_v5 = vpop.f32.mrf.mxu3  ;;  %884 = vmatmul.bf16.gmra.mxu0 %v786_v4 }
 0x29d   :  { %v716_v7 = vadd.f32 %v1906_v30, %v715_v5 }
 0x29f   :  { %v759_v9 = vmul.f32 0.2, %v716_v7  ;;  %vm743_vm8 = vcmp.ge.f32.partialorder %v716_v7, 0.0 }
 0x2a1   :  { %v775_v14 = vsel %vm743_vm8, %v716_v7, %v759_v9 }
 0x2a4   :  { %v717_v8 = vpop.f32.mrf.mxu3 }
 0x2a5   :  { %v718_v10 = vadd.f32 %v1906_v30, %v717_v8  ;;  %v1681_v8 = vld [vmem:[#allocation5 + $0x1b0] sm:$0xff] }
 0x2a6   :  { %1212 = vmatpush.bf16.msrb.mxu2 %v1681_v8 }
 0x2a7   :  { %v760_v11 = vmul.f32 0.2, %v718_v10  ;;  %vm744_vm9 = vcmp.ge.f32.partialorder %v718_v10, 0.0 }
 0x2a9   :  { %v776_v15 = vsel %vm744_vm9, %v718_v10, %v760_v11 }
 0x2aa   :  { %v787_v16 = vpack.c.bf16 %v776_v15, %v775_v14  ;;  %v1680_v14 = vld [vmem:[#allocation5 + $0x1a8] sm:$0xff] }
 0x2ab   :  { %1213 = vmatpush.bf16.msrb.mxu2 %v1680_v14 }
 0x2ac   :  { %v720_v17 = vpop.f32.mrf.mxu3  ;;  %889 = vmatmul.bf16.gmra.mxu0 %v787_v16 }
 0x2ad   :  { %v721_v42 = vadd.f32 %v1906_v30, %v720_v17 }
 0x2af   :  { %v761_v19 = vmul.f32 0.2, %v721_v42  ;;  %vm745_vm10 = vcmp.ge.f32.partialorder %v721_v42, 0.0 }
 0x2b1   :  { %v777_v23 = vsel %vm745_vm10, %v721_v42, %v761_v19 }
 0x2b4   :  { %v722_v18 = vpop.f32.mrf.mxu3 }
 0x2b5   :  { %v723_v20 = vadd.f32 %v1906_v30, %v722_v18 }
 0x2b7   :  { %v762_v21 = vmul.f32 0.2, %v723_v20  ;;  %vm746_vm11 = vcmp.ge.f32.partialorder %v723_v20, 0.0 }
 0x2b9   :  { %v778_v24 = vsel %vm746_vm11, %v723_v20, %v762_v21 }
 0x2ba   :  { %v788_v25 = vpack.c.bf16 %v778_v24, %v777_v23  ;;  %v1679_v23 = vld [vmem:[#allocation5 + $0x1a0] sm:$0xff] }
 0x2bb   :  { %1214 = vmatpush.bf16.msrb.mxu2 %v1679_v23 }
 0x2bc   :  { %v725_v26 = vpop.f32.mrf.mxu3  ;;  %894 = vmatmul.bf16.gmra.mxu0 %v788_v25 }
 0x2bd   :  { %v726_v28 = vadd.f32 %v1906_v30, %v725_v26 }
 0x2bf   :  { %v763_v31 = vmul.f32 0.2, %v726_v28  ;;  %vm747_vm12 = vcmp.ge.f32.partialorder %v726_v28, 0.0 }
 0x2c1   :  { %v779_v33 = vsel %vm747_vm12, %v726_v28, %v763_v31 }
 0x2c4   :  { %v727_v29 = vpop.f32.mrf.mxu3 }
 0x2c5   :  { %v728_v13 = vadd.f32 %v1906_v30, %v727_v29  ;;  %v1678_v29 = vld [vmem:[#allocation5 + $0x198] sm:$0xff] }
 0x2c6   :  { %1215 = vmatpush.bf16.msrb.mxu2 %v1678_v29 }
 0x2c7   :  { %vm748_vm13 = vcmp.ge.f32.partialorder %v728_v13, 0.0  ;;  %v764_v32 = vmul.f32 0.2, %v728_v13 }
 0x2c9   :  { %v780_v34 = vsel %vm748_vm13, %v728_v13, %v764_v32 }
 0x2ca   :  { %v789_v35 = vpack.c.bf16 %v780_v34, %v779_v33 }
 0x2cc   :  { %v730_v36 = vpop.f32.mrf.mxu3  ;;  %899 = vmatmul.bf16.gmra.mxu0 %v789_v35 }
 0x2cd   :  { %v731_v38 = vadd.f32 %v1906_v30, %v730_v36 }
 0x2cf   :  { %v765_v40 = vmul.f32 0.2, %v731_v38  ;;  %vm749_vm14 = vcmp.ge.f32.partialorder %v731_v38, 0.0 }
 0x2d1   :  { %v781_v44 = vsel %vm749_vm14, %v731_v38, %v765_v40 }
 0x2d4   :  { %v732_v39 = vpop.f32.mrf.mxu3 }
 0x2d5   :  { %v733_v41 = vadd.f32 %v1906_v30, %v732_v39  ;;  %v1677_v39 = vld [vmem:[#allocation5 + $0x190] sm:$0xff] }
 0x2d6   :  { %1216 = vmatpush.bf16.msrb.mxu2 %v1677_v39 }
 0x2d7   :  { %vm750_vm15 = vcmp.ge.f32.partialorder %v733_v41, 0.0  ;;  %v766_v43 = vmul.f32 0.2, %v733_v41 }
 0x2d9   :  { %v782_v45 = vsel %vm750_vm15, %v733_v41, %v766_v43 }
 0x2da   :  { %v790_v46 = vpack.c.bf16 %v782_v45, %v781_v44  ;;  %v1676_v45 = vld [vmem:[#allocation5 + $0x188] sm:$0xff] }
 0x2db   :  { %1217 = vmatpush.bf16.msrb.mxu2 %v1676_v45 }
 0x2dc   :  { %904 = vmatmul.bf16.gmra.mxu0 %v790_v46 }
 0x2e9   :  { %v870_v47 = vpop.f32.mrf.mxu0 }
 0x2ea   :  { %v871_v49 = vadd.f32 %v1924_v48, %v870_v47 }
 0x2ec   :  { %v926_v51 = vmul.f32 0.2, %v871_v49  ;;  %vm910_vm0 = vcmp.ge.f32.partialorder %v871_v49, 0.0 }
 0x2ee   :  { %v942_v30 = vsel %vm910_vm0, %v871_v49, %v926_v51 }
 0x2f1   :  { %v872_v50 = vpop.f32.mrf.mxu0 }
 0x2f2   :  { %v873_v52 = vadd.f32 %v1924_v48, %v872_v50 }
 0x2f4   :  { %vm911_vm1 = vcmp.ge.f32.partialorder %v873_v52, 0.0  ;;  %v927_v53 = vmul.f32 0.2, %v873_v52 }
 0x2f6   :  { %v943_v54 = vsel %vm911_vm1, %v873_v52, %v927_v53 }
 0x2f7   :  { %v958_v55 = vpack.c.bf16 %v943_v54, %v942_v30 }
 0x2f9   :  { %v875_v56 = vpop.f32.mrf.mxu0  ;;  %1044 = vmatmul.bf16.vlgmr.msrb.gmra.mxu1 %v958_v55  ;;  %v1675_v55 = vld [vmem:[#allocation5 + $0x180] sm:$0xff] }
 0x2fa   :  { %v876_v57 = vadd.f32 %v1924_v48, %v875_v56  ;;  %1218 = vmatpush.bf16.msrb.mxu2 %v1675_v55 }
 0x2fc   :  { %v928_v59 = vmul.f32 0.2, %v876_v57  ;;  %vm912_vm2 = vcmp.ge.f32.partialorder %v876_v57, 0.0 }
 0x2fe   :  { %v944_v63 = vsel %vm912_vm2, %v876_v57, %v928_v59 }
 0x301   :  { %v877_v58 = vpop.f32.mrf.mxu0 }
 0x302   :  { %v878_v60 = vadd.f32 %v1924_v48, %v877_v58 }
 0x304   :  { %v929_v61 = vmul.f32 0.2, %v878_v60  ;;  %vm913_vm3 = vcmp.ge.f32.partialorder %v878_v60, 0.0 }
 0x306   :  { %v945_v0 = vsel %vm913_vm3, %v878_v60, %v929_v61 }
 0x307   :  { %v959_v1 = vpack.c.bf16 %v945_v0, %v944_v63 }
 0x309   :  { %v880_v2 = vpop.f32.mrf.mxu0  ;;  %1049 = vmatmul.bf16.gmra.mxu1 %v959_v1  ;;  %v1942_v1 = vld [vmem:[#allocation7 + $0x5] ss:$0 sm:$0xff] }
 0x30a   :  { %v881_v3 = vadd.f32 %v1924_v48, %v880_v2 }
 0x30c   :  { %v930_v5 = vmul.f32 0.2, %v881_v3  ;;  %vm914_vm4 = vcmp.ge.f32.partialorder %v881_v3, 0.0 }
 0x30e   :  { %v946_v9 = vsel %vm914_vm4, %v881_v3, %v930_v5 }
 0x311   :  { %v882_v4 = vpop.f32.mrf.mxu0 }
 0x312   :  { %v883_v6 = vadd.f32 %v1924_v48, %v882_v4 }
 0x314   :  { %v931_v7 = vmul.f32 0.2, %v883_v6  ;;  %vm915_vm5 = vcmp.ge.f32.partialorder %v883_v6, 0.0 }
 0x316   :  { %v947_v10 = vsel %vm915_vm5, %v883_v6, %v931_v7 }
 0x317   :  { %v960_v11 = vpack.c.bf16 %v947_v10, %v946_v9 }
 0x319   :  { %v885_v12 = vpop.f32.mrf.mxu0  ;;  %1054 = vmatmul.bf16.gmra.mxu1 %v960_v11 }
 0x31a   :  { %v886_v15 = vadd.f32 %v1924_v48, %v885_v12 }
 0x31c   :  { %v932_v17 = vmul.f32 0.2, %v886_v15  ;;  %vm916_vm6 = vcmp.ge.f32.partialorder %v886_v15, 0.0 }
 0x31e   :  { %v948_v19 = vsel %vm916_vm6, %v886_v15, %v932_v17 }
 0x321   :  { %v887_v16 = vpop.f32.mrf.mxu0 }
 0x322   :  { %v888_v42 = vadd.f32 %v1924_v48, %v887_v16 }
 0x324   :  { %v933_v18 = vmul.f32 0.2, %v888_v42  ;;  %vm917_vm7 = vcmp.ge.f32.partialorder %v888_v42, 0.0 }
 0x326   :  { %v949_v20 = vsel %vm917_vm7, %v888_v42, %v933_v18 }
 0x327   :  { %v961_v21 = vpack.c.bf16 %v949_v20, %v948_v19 }
 0x329   :  { %v890_v22 = vpop.f32.mrf.mxu0  ;;  %1059 = vmatmul.bf16.gmra.mxu1 %v961_v21 }
 0x32a   :  { %v891_v24 = vadd.f32 %v1924_v48, %v890_v22 }
 0x32c   :  { %v934_v26 = vmul.f32 0.2, %v891_v24  ;;  %vm918_vm8 = vcmp.ge.f32.partialorder %v891_v24, 0.0 }
 0x32e   :  { %v950_v31 = vsel %vm918_vm8, %v891_v24, %v934_v26 }
 0x331   :  { %v892_v25 = vpop.f32.mrf.mxu0 }
 0x332   :  { %v893_v27 = vadd.f32 %v1924_v48, %v892_v25 }
 0x334   :  { %v935_v28 = vmul.f32 0.2, %v893_v27  ;;  %vm919_vm9 = vcmp.ge.f32.partialorder %v893_v27, 0.0 }
 0x336   :  { %v951_v13 = vsel %vm919_vm9, %v893_v27, %v935_v28 }
 0x337   :  { %v962_v32 = vpack.c.bf16 %v951_v13, %v950_v31 }
 0x339   :  { %v895_v33 = vpop.f32.mrf.mxu0  ;;  %1064 = vmatmul.bf16.gmra.mxu1 %v962_v32 }
 0x33a   :  { %v896_v34 = vadd.f32 %v1924_v48, %v895_v33 }
 0x33c   :  { %v936_v36 = vmul.f32 0.2, %v896_v34  ;;  %vm920_vm10 = vcmp.ge.f32.partialorder %v896_v34, 0.0 }
 0x33e   :  { %v952_v40 = vsel %vm920_vm10, %v896_v34, %v936_v36 }
 0x341   :  { %v897_v35 = vpop.f32.mrf.mxu0 }
 0x342   :  { %v898_v37 = vadd.f32 %v1924_v48, %v897_v35 }
 0x344   :  { %v937_v38 = vmul.f32 0.2, %v898_v37  ;;  %vm921_vm11 = vcmp.ge.f32.partialorder %v898_v37, 0.0 }
 0x346   :  { %v953_v41 = vsel %vm921_vm11, %v898_v37, %v937_v38 }
 0x347   :  { %v963_v43 = vpack.c.bf16 %v953_v41, %v952_v40 }
 0x349   :  { %v900_v44 = vpop.f32.mrf.mxu0  ;;  %1069 = vmatmul.bf16.gmra.mxu1 %v963_v43 }
 0x34a   :  { %v901_v46 = vadd.f32 %v1924_v48, %v900_v44 }
 0x34c   :  { %v938_v49 = vmul.f32 0.2, %v901_v46  ;;  %vm922_vm12 = vcmp.ge.f32.partialorder %v901_v46, 0.0 }
 0x34e   :  { %v954_v52 = vsel %vm922_vm12, %v901_v46, %v938_v49 }
 0x351   :  { %v902_v47 = vpop.f32.mrf.mxu0 }
 0x352   :  { %v903_v50 = vadd.f32 %v1924_v48, %v902_v47 }
 0x354   :  { %vm923_vm13 = vcmp.ge.f32.partialorder %v903_v50, 0.0  ;;  %v939_v51 = vmul.f32 0.2, %v903_v50 }
 0x356   :  { %v955_v53 = vsel %vm923_vm13, %v903_v50, %v939_v51 }
 0x357   :  { %v964_v30 = vpack.c.bf16 %v955_v53, %v954_v52 }
 0x359   :  { %v905_v54 = vpop.f32.mrf.mxu0  ;;  %1074 = vmatmul.bf16.gmra.mxu1 %v964_v30 }
 0x35a   :  { %v906_v56 = vadd.f32 %v1924_v48, %v905_v54 }
 0x35c   :  { %v940_v58 = vmul.f32 0.2, %v906_v56  ;;  %vm924_vm14 = vcmp.ge.f32.partialorder %v906_v56, 0.0 }
 0x35e   :  { %v956_v61 = vsel %vm924_vm14, %v906_v56, %v940_v58 }
 0x361   :  { %v907_v57 = vpop.f32.mrf.mxu0 }
 0x362   :  { %v908_v59 = vadd.f32 %v1924_v48, %v907_v57 }
 0x364   :  { %vm925_vm15 = vcmp.ge.f32.partialorder %v908_v59, 0.0  ;;  %v941_v60 = vmul.f32 0.2, %v908_v59 }
 0x366   :  { %v957_v62 = vsel %vm925_vm15, %v908_v59, %v941_v60 }
 0x367   :  { %v965_v63 = vpack.c.bf16 %v957_v62, %v956_v61 }
 0x369   :  { %1079 = vmatmul.bf16.gmra.mxu1 %v965_v63 }
 0x376   :  { %v1045_v0 = vpop.f32.mrf.mxu1 }
 0x377   :  { %v1046_v2 = vadd.f32 %v1942_v1, %v1045_v0 }
 0x379   :  { %v1101_v4 = vmul.f32 0.2, %v1046_v2  ;;  %vm1085_vm0 = vcmp.ge.f32.partialorder %v1046_v2, 0.0 }
 0x37b   :  { %v1117_v48 = vsel %vm1085_vm0, %v1046_v2, %v1101_v4 }
 0x37e   :  { %v1047_v3 = vpop.f32.mrf.mxu1 }
 0x37f   :  { %v1048_v5 = vadd.f32 %v1942_v1, %v1047_v3 }
 0x381   :  { %vm1086_vm1 = vcmp.ge.f32.partialorder %v1048_v5, 0.0  ;;  %v1102_v6 = vmul.f32 0.2, %v1048_v5 }
 0x383   :  { %v1118_v7 = vsel %vm1086_vm1, %v1048_v5, %v1102_v6 }
 0x384   :  { %v1133_v8 = vpack.c.bf16 %v1118_v7, %v1117_v48 }
 0x386   :  { %v1050_v9 = vpop.f32.mrf.mxu1  ;;  %1219 = vmatmul.bf16.vlgmr.msrb.gmra.mxu2 %v1133_v8 }
 0x387   :  { %v1051_v10 = vadd.f32 %v1942_v1, %v1050_v9  ;;  %v1960_v9 = vld [vmem:[#allocation7 + $0x6] ss:$0 sm:$0xff] }
 0x389   :  { %v1103_v12 = vmul.f32 0.2, %v1051_v10  ;;  %vm1087_vm2 = vcmp.ge.f32.partialorder %v1051_v10, 0.0 }
 0x38b   :  { %v1119_v16 = vsel %vm1087_vm2, %v1051_v10, %v1103_v12  ;;  %v1966_v12 = vld [vmem:[%s2066_s3] ss:$0 sm:$0xff] }
 0x38e   :  { %v1052_v11 = vpop.f32.mrf.mxu1 }
 0x38f   :  { %v1053_v14 = vadd.f32 %v1942_v1, %v1052_v11 }
 0x391   :  { %v1104_v15 = vmul.f32 0.2, %v1053_v14  ;;  %vm1088_vm3 = vcmp.ge.f32.partialorder %v1053_v14, 0.0 }
 0x393   :  { %v1120_v17 = vsel %vm1088_vm3, %v1053_v14, %v1104_v15 }
 0x394   :  { %v1134_v42 = vpack.c.bf16 %v1120_v17, %v1119_v16 }
 0x396   :  { %v1055_v18 = vpop.f32.mrf.mxu1  ;;  %1224 = vmatmul.bf16.gmra.mxu2 %v1134_v42 }
 0x397   :  { %v1056_v19 = vadd.f32 %v1942_v1, %v1055_v18 }
 0x399   :  { %v1105_v21 = vmul.f32 0.2, %v1056_v19  ;;  %vm1089_vm4 = vcmp.ge.f32.partialorder %v1056_v19, 0.0 }
 0x39b   :  { %v1121_v24 = vsel %vm1089_vm4, %v1056_v19, %v1105_v21 }
 0x39e   :  { %v1057_v20 = vpop.f32.mrf.mxu1 }
 0x39f   :  { %v1058_v22 = vadd.f32 %v1942_v1, %v1057_v20 }
 0x3a1   :  { %v1106_v23 = vmul.f32 0.2, %v1058_v22  ;;  %vm1090_vm5 = vcmp.ge.f32.partialorder %v1058_v22, 0.0 }
 0x3a3   :  { %v1122_v25 = vsel %vm1090_vm5, %v1058_v22, %v1106_v23 }
 0x3a4   :  { %v1135_v26 = vpack.c.bf16 %v1122_v25, %v1121_v24 }
 0x3a6   :  { %v1060_v27 = vpop.f32.mrf.mxu1  ;;  %1229 = vmatmul.bf16.gmra.mxu2 %v1135_v26 }
 0x3a7   :  { %v1061_v28 = vadd.f32 %v1942_v1, %v1060_v27 }
 0x3a9   :  { %v1107_v31 = vmul.f32 0.2, %v1061_v28  ;;  %vm1091_vm6 = vcmp.ge.f32.partialorder %v1061_v28, 0.0 }
 0x3ab   :  { %v1123_v33 = vsel %vm1091_vm6, %v1061_v28, %v1107_v31 }
 0x3ae   :  { %v1062_v29 = vpop.f32.mrf.mxu1 }
 0x3af   :  { %v1063_v13 = vadd.f32 %v1942_v1, %v1062_v29 }
 0x3b1   :  { %v1108_v32 = vmul.f32 0.2, %v1063_v13  ;;  %vm1092_vm7 = vcmp.ge.f32.partialorder %v1063_v13, 0.0 }
 0x3b3   :  { %v1124_v34 = vsel %vm1092_vm7, %v1063_v13, %v1108_v32 }
 0x3b4   :  { %v1136_v35 = vpack.c.bf16 %v1124_v34, %v1123_v33 }
 0x3b6   :  { %v1065_v36 = vpop.f32.mrf.mxu1  ;;  %1234 = vmatmul.bf16.gmra.mxu2 %v1136_v35 }
 0x3b7   :  { %v1066_v37 = vadd.f32 %v1942_v1, %v1065_v36 }
 0x3b9   :  { %v1109_v39 = vmul.f32 0.2, %v1066_v37  ;;  %vm1093_vm8 = vcmp.ge.f32.partialorder %v1066_v37, 0.0 }
 0x3bb   :  { %v1125_v43 = vsel %vm1093_vm8, %v1066_v37, %v1109_v39 }
 0x3be   :  { %v1067_v38 = vpop.f32.mrf.mxu1 }
 0x3bf   :  { %v1068_v40 = vadd.f32 %v1942_v1, %v1067_v38 }
 0x3c1   :  { %v1110_v41 = vmul.f32 0.2, %v1068_v40  ;;  %vm1094_vm9 = vcmp.ge.f32.partialorder %v1068_v40, 0.0 }
 0x3c3   :  { %v1126_v44 = vsel %vm1094_vm9, %v1068_v40, %v1110_v41 }
 0x3c4   :  { %v1137_v45 = vpack.c.bf16 %v1126_v44, %v1125_v43 }
 0x3c6   :  { %v1070_v46 = vpop.f32.mrf.mxu1  ;;  %1239 = vmatmul.bf16.gmra.mxu2 %v1137_v45 }
 0x3c7   :  { %v1071_v47 = vadd.f32 %v1942_v1, %v1070_v46 }
 0x3c9   :  { %v1111_v50 = vmul.f32 0.2, %v1071_v47  ;;  %vm1095_vm10 = vcmp.ge.f32.partialorder %v1071_v47, 0.0 }
 0x3cb   :  { %v1127_v53 = vsel %vm1095_vm10, %v1071_v47, %v1111_v50 }
 0x3ce   :  { %v1072_v49 = vpop.f32.mrf.mxu1 }
 0x3cf   :  { %v1073_v51 = vadd.f32 %v1942_v1, %v1072_v49 }
 0x3d1   :  { %v1112_v52 = vmul.f32 0.2, %v1073_v51  ;;  %vm1096_vm11 = vcmp.ge.f32.partialorder %v1073_v51, 0.0 }
 0x3d3   :  { %v1128_v30 = vsel %vm1096_vm11, %v1073_v51, %v1112_v52 }
 0x3d4   :  { %v1138_v54 = vpack.c.bf16 %v1128_v30, %v1127_v53 }
 0x3d6   :  { %v1075_v55 = vpop.f32.mrf.mxu1  ;;  %1244 = vmatmul.bf16.gmra.mxu2 %v1138_v54 }
 0x3d7   :  { %v1076_v56 = vadd.f32 %v1942_v1, %v1075_v55 }
 0x3d9   :  { %v1113_v58 = vmul.f32 0.2, %v1076_v56  ;;  %vm1097_vm12 = vcmp.ge.f32.partialorder %v1076_v56, 0.0 }
 0x3db   :  { %v1129_v61 = vsel %vm1097_vm12, %v1076_v56, %v1113_v58 }
 0x3de   :  { %v1077_v57 = vpop.f32.mrf.mxu1 }
 0x3df   :  { %v1078_v59 = vadd.f32 %v1942_v1, %v1077_v57 }
 0x3e1   :  { %vm1098_vm13 = vcmp.ge.f32.partialorder %v1078_v59, 0.0  ;;  %v1114_v60 = vmul.f32 0.2, %v1078_v59 }
 0x3e3   :  { %v1130_v62 = vsel %vm1098_vm13, %v1078_v59, %v1114_v60 }
 0x3e4   :  { %v1139_v63 = vpack.c.bf16 %v1130_v62, %v1129_v61 }
 0x3e6   :  { %v1080_v0 = vpop.f32.mrf.mxu1  ;;  %1249 = vmatmul.bf16.gmra.mxu2 %v1139_v63 }
 0x3e7   :  { %v1081_v2 = vadd.f32 %v1942_v1, %v1080_v0 }
 0x3e9   :  { %v1115_v4 = vmul.f32 0.2, %v1081_v2  ;;  %vm1099_vm14 = vcmp.ge.f32.partialorder %v1081_v2, 0.0 }
 0x3eb   :  { %v1131_v48 = vsel %vm1099_vm14, %v1081_v2, %v1115_v4 }
 0x3ee   :  { %v1082_v3 = vpop.f32.mrf.mxu1 }
 0x3ef   :  { %v1083_v5 = vadd.f32 %v1942_v1, %v1082_v3 }
 0x3f1   :  { %vm1100_vm15 = vcmp.ge.f32.partialorder %v1083_v5, 0.0  ;;  %v1116_v6 = vmul.f32 0.2, %v1083_v5 }
 0x3f3   :  { %v1132_v7 = vsel %vm1100_vm15, %v1083_v5, %v1116_v6  ;;  %vm1380_vm15 = vcmask 7168  }
 0x3f4   :  { %v1140_v8 = vpack.c.bf16 %v1132_v7, %v1131_v48 }
 0x3f6   :  { %1254 = vmatmul.bf16.gmra.mxu2 %v1140_v8 }
 0x409   :  { %v1220_v10 = vpop.f32.mrf.mxu2 }
 0x40a   :  { %v1221_v11 = vadd.f32 %v1960_v9, %v1220_v10 }
 0x40c   :  { %v1276_v14 = vmul.f32 0.2, %v1221_v11  ;;  %vm1260_vm0 = vcmp.ge.f32.partialorder %v1221_v11, 0.0 }
 0x40e   :  { %v1292_v1 = vsel %vm1260_vm0, %v1221_v11, %v1276_v14 }
 0x40f   :  { %v1312_v15 = vmul.f32 %v1966_v12, %v1292_v1 }
 0x411   :  { %v1222_v16 = vpop.f32.mrf.mxu2  ;;  %1328 = vadd.xlane.f32.xlu0 %v1312_v15 }
 0x412   :  { %v1223_v17 = vadd.f32 %v1960_v9, %v1222_v16 }
 0x414   :  { %v1277_v42 = vmul.f32 0.2, %v1223_v17  ;;  %vm1261_vm1 = vcmp.ge.f32.partialorder %v1223_v17, 0.0 }
 0x416   :  { %v1293_v18 = vsel %vm1261_vm1, %v1223_v17, %v1277_v42 }
 0x417   :  { %v1313_v19 = vmul.f32 %v1966_v12, %v1293_v18 }
 0x419   :  { %v1225_v20 = vpop.f32.mrf.mxu2  ;;  %1330 = vadd.xlane.f32.xlu0 %v1313_v19 }
 0x41a   :  { %v1226_v21 = vadd.f32 %v1960_v9, %v1225_v20 }
 0x41c   :  { %v1278_v22 = vmul.f32 0.2, %v1226_v21  ;;  %vm1262_vm2 = vcmp.ge.f32.partialorder %v1226_v21, 0.0 }
 0x41e   :  { %v1294_v23 = vsel %vm1262_vm2, %v1226_v21, %v1278_v22 }
 0x41f   :  { %v1314_v24 = vmul.f32 %v1966_v12, %v1294_v23 }
 0x421   :  { %v1227_v25 = vpop.f32.mrf.mxu2  ;;  %1332 = vadd.xlane.f32.xlu1 %v1314_v24  ;;  %v1724_v24 = vld [vmem:[#allocation2] ss:$0 sm:$0xff] }
 0x422   :  { %v1228_v26 = vadd.f32 %v1960_v9, %v1227_v25 }
 0x424   :  { %v1279_v27 = vmul.f32 0.2, %v1228_v26  ;;  %vm1263_vm3 = vcmp.ge.f32.partialorder %v1228_v26, 0.0 }
 0x426   :  { %v1295_v28 = vsel %vm1263_vm3, %v1228_v26, %v1279_v27 }
 0x427   :  { %v1315_v29 = vmul.f32 %v1966_v12, %v1295_v28 }
 0x429   :  { %v1230_v31 = vpop.f32.mrf.mxu2  ;;  %1334 = vadd.xlane.f32.xlu1 %v1315_v29 }
 0x42a   :  { %v1231_v13 = vadd.f32 %v1960_v9, %v1230_v31 }
 0x42c   :  { %v1280_v32 = vmul.f32 0.2, %v1231_v13  ;;  %vm1264_vm4 = vcmp.ge.f32.partialorder %v1231_v13, 0.0 }
 0x42e   :  { %v1296_v33 = vsel %vm1264_vm4, %v1231_v13, %v1280_v32 }
 0x42f   :  { %v1316_v34 = vmul.f32 %v1966_v12, %v1296_v33 }
 0x431   :  { %v1232_v35 = vpop.f32.mrf.mxu2  ;;  %1336 = vadd.xlane.f32.xlu2 %v1316_v34 }
 0x432   :  { %v1233_v36 = vadd.f32 %v1960_v9, %v1232_v35 }
 0x434   :  { %v1281_v37 = vmul.f32 0.2, %v1233_v36  ;;  %vm1265_vm5 = vcmp.ge.f32.partialorder %v1233_v36, 0.0 }
 0x436   :  { %v1297_v38 = vsel %vm1265_vm5, %v1233_v36, %v1281_v37 }
 0x437   :  { %v1317_v39 = vmul.f32 %v1966_v12, %v1297_v38 }
 0x439   :  { %v1235_v40 = vpop.f32.mrf.mxu2  ;;  %1338 = vadd.xlane.f32.xlu2 %v1317_v39 }
 0x43a   :  { %v1236_v41 = vadd.f32 %v1960_v9, %v1235_v40 }
 0x43c   :  { %v1282_v43 = vmul.f32 0.2, %v1236_v41  ;;  %vm1266_vm6 = vcmp.ge.f32.partialorder %v1236_v41, 0.0 }
 0x43e   :  { %v1298_v44 = vsel %vm1266_vm6, %v1236_v41, %v1282_v43 }
 0x43f   :  { %v1318_v45 = vmul.f32 %v1966_v12, %v1298_v44 }
 0x441   :  { %v1237_v46 = vpop.f32.mrf.mxu2  ;;  %1340 = vadd.xlane.f32.xlu0 %v1318_v45 }
 0x442   :  { %v1238_v47 = vadd.f32 %v1960_v9, %v1237_v46 }
 0x444   :  { %v1283_v49 = vmul.f32 0.2, %v1238_v47  ;;  %vm1267_vm7 = vcmp.ge.f32.partialorder %v1238_v47, 0.0 }
 0x446   :  { %v1299_v50 = vsel %vm1267_vm7, %v1238_v47, %v1283_v49 }
 0x447   :  { %v1319_v51 = vmul.f32 %v1966_v12, %v1299_v50 }
 0x449   :  { %v1240_v52 = vpop.f32.mrf.mxu2  ;;  %1342 = vadd.xlane.f32.xlu1 %v1319_v51 }
 0x44a   :  { %v1241_v53 = vadd.f32 %v1960_v9, %v1240_v52 }
 0x44c   :  { %v1284_v30 = vmul.f32 0.2, %v1241_v53  ;;  %vm1268_vm8 = vcmp.ge.f32.partialorder %v1241_v53, 0.0 }
 0x44e   :  { %v1300_v54 = vsel %vm1268_vm8, %v1241_v53, %v1284_v30 }
 0x44f   :  { %v1320_v55 = vmul.f32 %v1966_v12, %v1300_v54 }
 0x451   :  { %v1242_v56 = vpop.f32.mrf.mxu2  ;;  %1344 = vadd.xlane.f32.xlu2 %v1320_v55 }
 0x452   :  { %v1243_v57 = vadd.f32 %v1960_v9, %v1242_v56 }
 0x454   :  { %v1285_v58 = vmul.f32 0.2, %v1243_v57  ;;  %vm1269_vm9 = vcmp.ge.f32.partialorder %v1243_v57, 0.0 }
 0x456   :  { %v1301_v59 = vsel %vm1269_vm9, %v1243_v57, %v1285_v58 }
 0x457   :  { %v1321_v60 = vmul.f32 %v1966_v12, %v1301_v59 }
 0x459   :  { %v1245_v61 = vpop.f32.mrf.mxu2  ;;  %1346 = vadd.xlane.f32.xlu0 %v1321_v60 }
 0x45a   :  { %v1246_v62 = vadd.f32 %v1960_v9, %v1245_v61 }
 0x45c   :  { %v1286_v63 = vmul.f32 0.2, %v1246_v62  ;;  %vm1270_vm10 = vcmp.ge.f32.partialorder %v1246_v62, 0.0 }
 0x45e   :  { %v1302_v0 = vsel %vm1270_vm10, %v1246_v62, %v1286_v63 }
 0x45f   :  { %v1322_v2 = vmul.f32 %v1966_v12, %v1302_v0 }
 0x461   :  { %v1247_v3 = vpop.f32.mrf.mxu2  ;;  %1348 = vadd.xlane.f32.xlu1 %v1322_v2 }
 0x462   :  { %v1248_v4 = vadd.f32 %v1960_v9, %v1247_v3 }
 0x464   :  { %v1287_v5 = vmul.f32 0.2, %v1248_v4  ;;  %vm1271_vm11 = vcmp.ge.f32.partialorder %v1248_v4, 0.0 }
 0x466   :  { %v1303_v6 = vsel %vm1271_vm11, %v1248_v4, %v1287_v5 }
 0x467   :  { %v1323_v48 = vmul.f32 %v1966_v12, %v1303_v6 }
 0x469   :  { %v1250_v7 = vpop.f32.mrf.mxu2  ;;  %1350 = vadd.xlane.f32.xlu2 %v1323_v48 }
 0x46a   :  { %v1251_v8 = vadd.f32 %v1960_v9, %v1250_v7 }
 0x46c   :  { %v1288_v10 = vmul.f32 0.2, %v1251_v8  ;;  %vm1272_vm12 = vcmp.ge.f32.partialorder %v1251_v8, 0.0 }
 0x46e   :  { %v1304_v11 = vsel %vm1272_vm12, %v1251_v8, %v1288_v10 }
 0x46f   :  { %v1324_v14 = vmul.f32 %v1966_v12, %v1304_v11 }
 0x471   :  { %v1252_v1 = vpop.f32.mrf.mxu2  ;;  %1352 = vadd.xlane.f32.xlu0 %v1324_v14 }
 0x472   :  { %v1253_v15 = vadd.f32 %v1960_v9, %v1252_v1 }
 0x474   :  { %v1289_v16 = vmul.f32 0.2, %v1253_v15  ;;  %vm1273_vm13 = vcmp.ge.f32.partialorder %v1253_v15, 0.0 }
 0x476   :  { %v1305_v17 = vsel %vm1273_vm13, %v1253_v15, %v1289_v16 }
 0x477   :  { %v1325_v42 = vmul.f32 %v1966_v12, %v1305_v17 }
 0x479   :  { %v1255_v18 = vpop.f32.mrf.mxu2  ;;  %1354 = vadd.xlane.f32.xlu1 %v1325_v42 }
 0x47a   :  { %v1256_v19 = vadd.f32 %v1960_v9, %v1255_v18 }
 0x47c   :  { %v1290_v20 = vmul.f32 0.2, %v1256_v19  ;;  %vm1274_vm14 = vcmp.ge.f32.partialorder %v1256_v19, 0.0 }
 0x47e   :  { %v1306_v21 = vsel %vm1274_vm14, %v1256_v19, %v1290_v20 }
 0x47f   :  { %v1326_v22 = vmul.f32 %v1966_v12, %v1306_v21 }
 0x481   :  { %v1257_v23 = vpop.f32.mrf.mxu2  ;;  %1356 = vadd.xlane.f32.xlu2 %v1326_v22 }
 0x482   :  { %v1258_v25 = vadd.f32 %v1960_v9, %v1257_v23 }
 0x484   :  { %v1291_v26 = vmul.f32 0.2, %v1258_v25  ;;  %v1329_v27 = vpop.xlane.xlu0 %1328  ;;  %vm1275_vm0 = vcmp.ge.f32.partialorder %v1258_v25, 0.0 }
 0x485   :  { %v1364_v28 = vadd.f32 %v1724_v24, %v1329_v27 }
 0x486   :  { %v1307_v29 = vsel %vm1275_vm0, %v1258_v25, %v1291_v26 }
 0x487   :  { %1381 = vst.msk [vmem:[%s2068_s5] sm:$0xff] %vm1380_vm15, %v1364_v28  ;;  %v1327_v31 = vmul.f32 %v1966_v12, %v1307_v29 }
 0x489   :  { %1358 = vadd.xlane.f32.xlu0 %v1327_v31 }
 0x48c   :  { %v1331_v13 = vpop.xlane.xlu0 %1330 }
 0x48d   :  { %v1365_v32 = vadd.f32 %v1724_v24, %v1331_v13 }
 0x48f   :  { %1382 = vst.msk [vmem:[%s2068_s5 + $0x8] sm:$0xff] %vm1380_vm15, %v1365_v32 }
 0x494   :  { %v1333_v9 = vpop.xlane.xlu1 %1332 }
 0x495   :  { %v1366_v33 = vadd.f32 %v1724_v24, %v1333_v9 }
 0x497   :  { %1383 = vst.msk [vmem:[%s2068_s5 + $0x10] sm:$0xff] %vm1380_vm15, %v1366_v33 }
 0x49c   :  { %v1335_v34 = vpop.xlane.xlu1 %1334 }
 0x49d   :  { %v1367_v35 = vadd.f32 %v1724_v24, %v1335_v34 }
 0x49f   :  { %1384 = vst.msk [vmem:[%s2068_s5 + $0x18] sm:$0xff] %vm1380_vm15, %v1367_v35 }
 0x4a4   :  { %v1337_v12 = vpop.xlane.xlu2 %1336 }
 0x4a5   :  { %v1368_v36 = vadd.f32 %v1724_v24, %v1337_v12 }
 0x4a7   :  { %1385 = vst.msk [vmem:[%s2068_s5 + $0x20] sm:$0xff] %vm1380_vm15, %v1368_v36 }
 0x4ac   :  { %v1339_v37 = vpop.xlane.xlu2 %1338 }
 0x4ad   :  { %v1369_v38 = vadd.f32 %v1724_v24, %v1339_v37 }
 0x4af   :  { %1386 = vst.msk [vmem:[%s2068_s5 + $0x28] sm:$0xff] %vm1380_vm15, %v1369_v38 }
 0x4b4   :  { %v1341_v39 = vpop.xlane.xlu0 %1340 }
 0x4b5   :  { %v1370_v40 = vadd.f32 %v1724_v24, %v1341_v39 }
 0x4b7   :  { %1387 = vst.msk [vmem:[%s2068_s5 + $0x30] sm:$0xff] %vm1380_vm15, %v1370_v40 }
 0x4bc   :  { %v1343_v41 = vpop.xlane.xlu1 %1342 }
 0x4bd   :  { %v1371_v43 = vadd.f32 %v1724_v24, %v1343_v41 }
 0x4bf   :  { %1388 = vst.msk [vmem:[%s2068_s5 + $0x38] sm:$0xff] %vm1380_vm15, %v1371_v43 }
 0x4c4   :  { %v1345_v44 = vpop.xlane.xlu2 %1344 }
 0x4c5   :  { %v1372_v45 = vadd.f32 %v1724_v24, %v1345_v44 }
 0x4c7   :  { %1389 = vst.msk [vmem:[%s2068_s5 + $0x40] sm:$0xff] %vm1380_vm15, %v1372_v45 }
 0x4cc   :  { %v1347_v46 = vpop.xlane.xlu0 %1346 }
 0x4cd   :  { %v1373_v47 = vadd.f32 %v1724_v24, %v1347_v46 }
 0x4cf   :  { %1390 = vst.msk [vmem:[%s2068_s5 + $0x48] sm:$0xff] %vm1380_vm15, %v1373_v47 }
 0x4d4   :  { %v1349_v49 = vpop.xlane.xlu1 %1348 }
 0x4d5   :  { %v1374_v50 = vadd.f32 %v1724_v24, %v1349_v49 }
 0x4d7   :  { %1391 = vst.msk [vmem:[%s2068_s5 + $0x50] sm:$0xff] %vm1380_vm15, %v1374_v50 }
 0x4dc   :  { %v1351_v51 = vpop.xlane.xlu2 %1350 }
 0x4dd   :  { %v1375_v52 = vadd.f32 %v1724_v24, %v1351_v51 }
 0x4df   :  { %1392 = vst.msk [vmem:[%s2068_s5 + $0x58] sm:$0xff] %vm1380_vm15, %v1375_v52 }
 0x4e4   :  { %v1353_v53 = vpop.xlane.xlu0 %1352 }
 0x4e5   :  { %v1376_v30 = vadd.f32 %v1724_v24, %v1353_v53 }
 0x4e7   :  { %1393 = vst.msk [vmem:[%s2068_s5 + $0x60] sm:$0xff] %vm1380_vm15, %v1376_v30 }
 0x4ec   :  { %v1355_v54 = vpop.xlane.xlu1 %1354 }
 0x4ed   :  { %v1377_v55 = vadd.f32 %v1724_v24, %v1355_v54 }
 0x4ef   :  { %1394 = vst.msk [vmem:[%s2068_s5 + $0x68] sm:$0xff] %vm1380_vm15, %v1377_v55 }
 0x4f4   :  { %v1357_v56 = vpop.xlane.xlu2 %1356 }
 0x4f5   :  { %v1378_v57 = vadd.f32 %v1724_v24, %v1357_v56 }
 0x4f7   :  { %1395 = vst.msk [vmem:[%s2068_s5 + $0x70] sm:$0xff] %vm1380_vm15, %v1378_v57 }
 0x4fc   :  { %v1359_v58 = vpop.xlane.xlu0 %1358 }
 0x4fd   :  { %v1379_v59 = vadd.f32 %v1724_v24, %v1359_v58 }
 0x4ff   :  { %1396 = vst.msk [vmem:[%s2068_s5 + $0x78] sm:$0xff] %vm1380_vm15, %v1379_v59 }
 0x500   :  { %1401 = vsyncpa [#allocation4], 1 }
 0x501   :  { %1402 = vsyncpa [#allocation6], 1 }

</bundles_post_ra>
